<compile_context>
chip_gen: v6e
topology: v6e:2x2x1
jax: 0.10.0
libtpu: 0.0.40
codegen_flags: <defaults>
</compile_context>

<pallas_src>
import numpy as np
import jax
import jax.numpy as jnp
from jax.experimental import pallas as pl
from jax.experimental.pallas import tpu as pltpu


def _round_up(x, m):
    return (x + m - 1) // m * m


def _masked_gru_kernel(gi_ref, h0_ref, len_ref, whh_ref, bhn_ref,
                       out_ref, hid_ref, h_sc):
    """grid = (batch_tiles, time_chunks); one grid step == Tc GRU time steps."""
    c = pl.program_id(1)
    Tc = gi_ref.shape[0]
    Hp = h_sc.shape[-1]

    @pl.when(c == 0)
    def _init():
        h_sc[...] = h0_ref[...]

    lens = len_ref[...]                          # (Bt, 1) int32 original lengths
    len_c = jnp.maximum(lens, 1)                 # lengths[lengths == 0] += 1
    nz = (lens != 0).astype(jnp.float32)         # zero_mask from the module

    whh = whh_ref[...]                           # (Hp, 3Hp) bf16 fused [r | z | n]
    b_hn = bhn_ref[...]                          # (1, Hp) f32 hidden bias of n-gate

    h = h_sc[...]                                # (Bt, Hp) f32 carried state
    t0 = c * Tc

    outs = []
    # Static unroll (Tc kept <= ~16). If Tc is raised much further, switch to
    # lax.fori_loop + pl.ds(pl.multiple_of(i*Hp,128), Hp) stores to bound
    # vreg pressure.
    for i in range(Tc):
        gi = gi_ref[i]                           # (Bt, 3Hp) bf16: x@W_ih + biases
        gh = jnp.dot(h.astype(jnp.bfloat16), whh,
                     preferred_element_type=jnp.float32)            # (Bt, 3Hp) f32
        pre_r = gi[:, :Hp].astype(jnp.float32) + gh[:, :Hp]
        pre_z = gi[:, Hp:2 * Hp].astype(jnp.float32) + gh[:, Hp:2 * Hp]
        # sigmoid(x) == 0.5*tanh(0.5*x) + 0.5 : a single EUP op per gate.
        r = 0.5 * jnp.tanh(0.5 * pre_r) + 0.5
        z = 0.5 * jnp.tanh(0.5 * pre_z) + 0.5
        n = jnp.tanh(gi[:, 2 * Hp:].astype(jnp.float32)
                     + r * (gh[:, 2 * Hp:] + b_hn))
        h_new = (1.0 - z) * n + z * h            # (Bt, Hp)

        sm = ((t0 + i) < len_c).astype(jnp.float32)   # (Bt, 1) inside-sequence
        h = sm * h_new + (1.0 - sm) * h               # freeze state after seq end
        outs.append(h_new * (sm * nz))                # zero-pad + zero_mask
    # One unmasked, lane-dense store per chunk (last dim multiple of 128).
    out_ref[...] = jnp.concatenate(outs, axis=1)
    h_sc[...] = h

    @pl.when(c == pl.num_programs(1) - 1)
    def _final():
        hid_ref[...] = h * nz                    # final hidden, written once per tile


def init_gru_params(key, input_size, hidden_size):
    """Raw nn.GRU-style params, U(-1/sqrt(H), 1/sqrt(H)), gate order [r; z; n]."""
    k = 1.0 / np.sqrt(hidden_size)
    k0, k1, k2, k3 = jax.random.split(key, 4)
    H = hidden_size
    w_ih = jax.random.uniform(k0, (3 * H, input_size), minval=-k, maxval=k,
                              dtype=jnp.float32)
    w_hh = jax.random.uniform(k1, (3 * H, H), minval=-k, maxval=k, dtype=jnp.float32)
    b_ih = jax.random.uniform(k2, (3 * H,), minval=-k, maxval=k, dtype=jnp.float32)
    b_hh = jax.random.uniform(k3, (3 * H,), minval=-k, maxval=k, dtype=jnp.float32)
    return w_ih, w_hh, b_ih, b_hh


def pack_gru_params(w_ih, w_hh, b_ih, b_hh):
    """Pack + lane-pad for the fused kernel.

    Returns: W_ih^T (I,3Hp) f32, W_hh^T (Hp,3Hp) bf16, combined gi bias (3Hp,)
    (r/z: b_ih+b_hh, n: b_ih only), b_hh_n (1,Hp) f32, plus true/padded H.
    Each gate block is zero-padded from H to Hp=round_up(H,128) so gate slices
    land on 128-lane boundaries; padded units provably stay 0 through the GRU.
    """
    H3, in_dim = w_ih.shape
    H = H3 // 3
    Hp = _round_up(H, 128)
    pad_c = (0, Hp - H)

    def pad_gates_lastdim(m):  # (..., 3H) -> (..., 3Hp), per-gate zero padding
        r, z, n = m[..., :H], m[..., H:2 * H], m[..., 2 * H:]
        padw = [(0, 0)] * (m.ndim - 1) + [pad_c]
        return jnp.concatenate(
            [jnp.pad(r, padw), jnp.pad(z, padw), jnp.pad(n, padw)], axis=-1)

    w_ih = jnp.asarray(w_ih, jnp.float32)
    w_hh = jnp.asarray(w_hh, jnp.float32)
    b_ih = jnp.asarray(b_ih, jnp.float32)
    b_hh = jnp.asarray(b_hh, jnp.float32)

    wih_cat = pad_gates_lastdim(w_ih.T)                                   # (I, 3Hp)
    whh_cat = jnp.pad(pad_gates_lastdim(w_hh.T),
                      ((0, Hp - H), (0, 0))).astype(jnp.bfloat16)         # (Hp, 3Hp)
    gi_bias = jnp.concatenate([jnp.pad(b_ih[:H] + b_hh[:H], pad_c),       # r
                               jnp.pad(b_ih[H:2 * H] + b_hh[H:2 * H], pad_c),  # z
                               jnp.pad(b_ih[2 * H:], pad_c)])             # n (input bias)
    b_hn = jnp.pad(b_hh[2 * H:], pad_c).reshape(1, Hp)                    # n hidden bias
    return dict(wih=wih_cat, whh=whh_cat, gib=gi_bias, bhn=b_hn, H=H, Hp=Hp)


def masked_gru(padded, lengths, params, initial_state=None, chunk=16,
               batch_tile=None, vmem_budget_bytes=48 << 20):
    """Pallas equivalent of MaskedGRU.forward.

    padded:  (B, T, I) float
    lengths: (B,) int (host-side / concrete; zeros allowed)
    returns: outputs (B, t_max, H), hidden (B, H), t_max = max(clamped lengths)

    Note: lengths must be concrete at trace time (t_max defines static shapes).
    """
    B, T, in_dim = padded.shape
    wih, whh, gib, bhn = params['wih'], params['whh'], params['gib'], params['bhn']
    H, Hp = params['H'], params['Hp']

    lengths_np = np.asarray(lengths, dtype=np.int32).reshape(B)
    t_max = int(np.maximum(lengths_np, 1).max())     # pad_packed_sequence out length

    # Batch tiling (parallel grid axis; exploits the 2 TensorCores on v7x).
    if batch_tile is None:
        Bt = _round_up(B, 8)
        n_b = 1
    else:
        Bt = _round_up(max(1, min(batch_tile, B)), 16)   # bf16 sublane-pack safe
        n_b = -(-B // Bt)
    Bp = n_b * Bt

    # Time chunking: balance chunks over t_max, then shrink Tc until the
    # (double-buffered) footprint fits the per-generation VMEM budget.
    n_chunks = max(1, -(-t_max // max(1, chunk)))
    Tc = -(-t_max // n_chunks)

    def footprint(tc):
        return (2 * tc * Bt * 3 * Hp * 2              # GI chunk (bf16), dbl-buffered
                + 2 * Bt * tc * Hp * 4                # out slab (f32), dbl-buffered
                + 2 * Bt * Hp * 4                     # final hidden out
                + 2 * Hp * 3 * Hp * 2                 # fused W_hh (bf16)
                + 2 * (Bt * Hp * 4 + Bt * 4 + Hp * 4)  # h0, lengths, b_hn
                + Bt * Hp * 4)                        # h_sc scratch

    while footprint(Tc) > vmem_budget_bytes and Tc > 1:
        Tc = (Tc + 1) // 2
    n_chunks = -(-t_max // Tc)
    T_pad = n_chunks * Tc

    # Hoisted input projection: one large XLA matmul (instead of T tiny ones
    # inside the recurrence), emitted time-major and cast to bf16 to halve the
    # kernel's dominant HBM read traffic. Combined biases folded in.
    x = jnp.zeros((Bp, T_pad, in_dim), jnp.float32).at[:B, :t_max].set(
        jnp.asarray(padded, jnp.float32)[:, :t_max])
    gi = (jnp.einsum('bti,ig->tbg', x, wih)
          + gib[None, None, :]).astype(jnp.bfloat16)              # (T_pad, Bp, 3Hp)

    if initial_state is None:
        h0 = jnp.zeros((Bp, Hp), jnp.float32)
    else:
        h0_b = jnp.asarray(initial_state, jnp.float32).reshape(B, H)
        h0 = jnp.zeros((Bp, Hp), jnp.float32).at[:B, :H].set(h0_b)

    len_arr = jnp.zeros((Bp, 1), jnp.int32).at[:B, 0].set(jnp.asarray(lengths_np))

    vmem_limit = int(min(max(int(footprint(Tc) * 1.5) + (1 << 20), 8 << 20), 64 << 20))

    out_flat, hidden = pl.pallas_call(
        _masked_gru_kernel,
        out_shape=(jax.ShapeDtypeStruct((Bp, T_pad * Hp), jnp.float32),
                   jax.ShapeDtypeStruct((Bp, Hp), jnp.float32)),
        grid_spec=pltpu.PrefetchScalarGridSpec(
            num_scalar_prefetch=0,
            grid=(n_b, n_chunks),
            in_specs=[
                pl.BlockSpec((Tc, Bt, 3 * Hp), lambda b, c: (c, b, 0)),   # GI chunk
                pl.BlockSpec((Bt, Hp), lambda b, c: (b, 0)),              # h0
                pl.BlockSpec((Bt, 1), lambda b, c: (b, 0)),               # lengths
                pl.BlockSpec((Hp, 3 * Hp), lambda b, c: (0, 0)),          # W_hh (resident)
                pl.BlockSpec((1, Hp), lambda b, c: (0, 0)),               # b_hh_n
            ],
            out_specs=[
                pl.BlockSpec((Bt, Tc * Hp), lambda b, c: (b, c)),         # lane-dense slab
                pl.BlockSpec((Bt, Hp), lambda b, c: (b, 0)),              # final hidden
            ],
            scratch_shapes=[pltpu.VMEM((Bt, Hp), jnp.float32)],           # state carry
        ),
        compiler_params=pltpu.CompilerParams(
            dimension_semantics=("parallel", "arbitrary"),                # batch || time seq
            vmem_limit_bytes=vmem_limit),
    )(gi, h0, len_arr, whh, bhn)

    # Free minor-dim split (already batch-first); slice off lane/batch padding.
    outputs = out_flat.reshape(Bp, T_pad, Hp)[:B, :t_max, :H]
    hidden = hidden[:B, :H]
    return outputs, hidden


def _reference_masked_gru(padded, lengths, raw_params, t_max):
    """Pure-JAX f32 reference (mirrors pack/pad GRU semantics) for validation."""
    w_ih, w_hh, b_ih, b_hh = [jnp.asarray(a, jnp.float32) for a in raw_params]
    H = w_hh.shape[1]
    B = padded.shape[0]
    lengths = jnp.asarray(np.asarray(lengths), jnp.int32)
    len_c = jnp.maximum(lengths, 1)
    nz = (lengths != 0).astype(jnp.float32)
    wih_t, whh_t = w_ih.T, w_hh.T

    def step(h, xt_t):
        x_t, t = xt_t
        gi = x_t @ wih_t + b_ih
        gh = h @ whh_t + b_hh
        r = jax.nn.sigmoid(gi[:, :H] + gh[:, :H])
        z = jax.nn.sigmoid(gi[:, H:2 * H] + gh[:, H:2 * H])
        n = jnp.tanh(gi[:, 2 * H:] + r * gh[:, 2 * H:])
        h_new = (1.0 - z) * n + z * h
        mask = (t < len_c)[:, None].astype(jnp.float32)
        h_next = mask * h_new + (1.0 - mask) * h
        return h_next, mask * h_new

    x_tm = jnp.transpose(jnp.asarray(padded, jnp.float32)[:, :t_max], (1, 0, 2))
    h_last, outs = jax.lax.scan(step, jnp.zeros((B, H), jnp.float32),
                                (x_tm, jnp.arange(t_max)))
    outputs = jnp.transpose(outs, (1, 0, 2)) * nz[:, None, None]
    hidden = h_last * nz[:, None]
    return outputs, hidden


if __name__ == "__main__":
    # Small shapes consistent with the module; T=20 exercises multiple chunks
    # (Tc=10, grid=(1,2)) plus the length-masking / zero-length paths.
    B, T, I, H = 8, 20, 16, 32
    key = jax.random.PRNGKey(0)
    k_x, k_p = jax.random.split(key)

    padded = jax.random.normal(k_x, (B, T, I), dtype=jnp.float32)
    # includes zero-length rows to exercise the zero_mask path
    lengths = np.array([20, 13, 0, 3, 17, 1, 8, 0], dtype=np.int32)

    raw = init_gru_params(k_p, I, H)
    params = pack_gru_params(*raw)

    outputs, hidden = masked_gru(padded, lengths, params)
    jax.block_until_ready((outputs, hidden))

    t_max = int(np.maximum(lengths, 1).max())
    ref_out, ref_hid = _reference_masked_gru(padded, lengths, raw, t_max)

    out_np, hid_np = np.asarray(outputs), np.asarray(hidden)
    # bf16 MXU operands (GI, W_hh, h) -> loose tolerance vs. the f32 reference.
    np.testing.assert_allclose(out_np, np.asarray(ref_out), rtol=3e-2, atol=3e-2)
    np.testing.assert_allclose(hid_np, np.asarray(ref_hid), rtol=3e-2, atol=3e-2)
    # Structural, tolerance-free checks of the masking semantics.
    for b in range(B):
        assert np.all(out_np[b, max(int(lengths[b]), 1):] == 0.0)
    assert np.all(out_np[lengths == 0] == 0.0)
    assert np.all(hid_np[lengths == 0] == 0.0)

    print("KERNEL_OK")
</pallas_src>

<mosaic_0001>
module attributes {stable_mosaic.version = 11 : i64} {
  func.func @_masked_gru_kernel(%arg0: i32, %arg1: i32, %arg2: memref<10x8x384xbf16, #tpu.memory_space<vmem>>, %arg3: memref<8x128xf32, #tpu.memory_space<vmem>>, %arg4: memref<8x1xi32, #tpu.memory_space<vmem>>, %arg5: memref<128x384xbf16, #tpu.memory_space<vmem>>, %arg6: memref<1x128xf32, #tpu.memory_space<vmem>>, %arg7: memref<8x1280xf32, #tpu.memory_space<vmem>>, %arg8: memref<8x128xf32, #tpu.memory_space<vmem>>, %arg9: memref<8x128xf32, #tpu.memory_space<vmem>>) attributes {dimension_semantics = [#tpu.dimension_semantics<parallel>, #tpu.dimension_semantics<arbitrary>], iteration_bounds = array<i64: 1, 2>, scalar_prefetch = 0 : i64, scratch_operands = 1 : i64, tpu.core_type = #tpu.core_type<tc>, window_params = [{transform_indices = @transform_0, window_bounds = array<i64: 10, 8, 384>}, {transform_indices = @transform_1, window_bounds = array<i64: 8, 128>}, {transform_indices = @transform_2, window_bounds = array<i64: 8, 1>}, {pipeline_mode = #tpu.pipeline_mode<synchronous>, transform_indices = @transform_3, window_bounds = array<i64: 128, 384>}, {pipeline_mode = #tpu.pipeline_mode<synchronous>, transform_indices = @transform_4, window_bounds = array<i64: 1, 128>}, {transform_indices = @transform_5, window_bounds = array<i64: 8, 1280>}, {transform_indices = @transform_6, window_bounds = array<i64: 8, 128>}]} {
    %c0_i32 = arith.constant 0 : i32
    %0 = arith.cmpi eq, %arg1, %c0_i32 : i32
    %1 = arith.extui %0 : i1 to i32
    %c0_i32_0 = arith.constant 0 : i32
    %2 = arith.cmpi ne, %1, %c0_i32_0 : i32
    scf.if %2 {
      %c0_127 = arith.constant 0 : index
      %c0_128 = arith.constant 0 : index
      %560 = vector.load %arg3[%c0_127, %c0_128] : memref<8x128xf32, #tpu.memory_space<vmem>>, vector<8x128xf32>
      %c0_129 = arith.constant 0 : index
      %c0_130 = arith.constant 0 : index
      %561 = vector.load %arg9[%c0_129, %c0_130] : memref<8x128xf32, #tpu.memory_space<vmem>>, vector<8x128xf32>
      tpu.vector_store %arg9[%c0_129, %c0_130], %560 {strides = array<i32>} : memref<8x128xf32, #tpu.memory_space<vmem>>, vector<8x128xf32>,
    } else {
    }
    %c0 = arith.constant 0 : index
    %c0_1 = arith.constant 0 : index
    %3 = vector.load %arg4[%c0, %c0_1] : memref<8x1xi32, #tpu.memory_space<vmem>>, vector<8x1xi32>
    %c1_i32 = arith.constant 1 : i32
    %4 = vector.broadcast %c1_i32 : i32 to vector<8x1xi32>
    %5 = arith.maxsi %3, %4 : vector<8x1xi32>
    %c0_i32_2 = arith.constant 0 : i32
    %6 = vector.broadcast %c0_i32_2 : i32 to vector<8x1xi32>
    %7 = arith.cmpi ne, %3, %6 : vector<8x1xi32>
    %8 = arith.extui %7 : vector<8x1xi1> to vector<8x1xi32>
    %9 = arith.sitofp %8 : vector<8x1xi32> to vector<8x1xf32>
    %c0_3 = arith.constant 0 : index
    %c0_4 = arith.constant 0 : index
    %10 = vector.load %arg5[%c0_3, %c0_4] : memref<128x384xbf16, #tpu.memory_space<vmem>>, vector<128x384xbf16>
    %c0_5 = arith.constant 0 : index
    %c0_6 = arith.constant 0 : index
    %11 = vector.load %arg6[%c0_5, %c0_6] : memref<1x128xf32, #tpu.memory_space<vmem>>, vector<1x128xf32>
    %c0_7 = arith.constant 0 : index
    %c0_8 = arith.constant 0 : index
    %12 = vector.load %arg9[%c0_7, %c0_8] : memref<8x128xf32, #tpu.memory_space<vmem>>, vector<8x128xf32>
    %c10_i32 = arith.constant 10 : i32
    %13 = arith.muli %arg1, %c10_i32 : i32
    %c0_9 = arith.constant 0 : index
    %c0_10 = arith.constant 0 : index
    %c0_11 = arith.constant 0 : index
    %14 = vector.load %arg2[%c0_9, %c0_10, %c0_11] : memref<10x8x384xbf16, #tpu.memory_space<vmem>>, vector<1x8x384xbf16>
    %15 = vector.shape_cast %14 : vector<1x8x384xbf16> to vector<8x384xbf16>
    %16 = arith.truncf %12 : vector<8x128xf32> to vector<8x128xbf16>
    %cst = arith.constant dense<0.000000e+00> : vector<8x384xf32>
    %17 = tpu.matmul %16, %10, %cst {dimension_numbers = #tpu.dot_dimension_numbers<[1], [0], [0], [1], [0, 0, 1, 1], [], []>} : vector<8x128xbf16>, vector<128x384xbf16>, vector<8x384xf32> -> vector<8x384xf32>
    %18 = vector.extract_strided_slice %15 {offsets = [0, 0], sizes = [8, 128], strides = [1, 1]} : vector<8x384xbf16> to vector<8x128xbf16>
    %19 = arith.extf %18 : vector<8x128xbf16> to vector<8x128xf32>
    %20 = vector.extract_strided_slice %17 {offsets = [0, 0], sizes = [8, 128], strides = [1, 1]} : vector<8x384xf32> to vector<8x128xf32>
    %21 = arith.addf %19, %20 : vector<8x128xf32>
    %22 = vector.extract_strided_slice %15 {offsets = [0, 128], sizes = [8, 128], strides = [1, 1]} : vector<8x384xbf16> to vector<8x128xbf16>
    %23 = arith.extf %22 : vector<8x128xbf16> to vector<8x128xf32>
    %24 = vector.extract_strided_slice %17 {offsets = [0, 128], sizes = [8, 128], strides = [1, 1]} : vector<8x384xf32> to vector<8x128xf32>
    %25 = arith.addf %23, %24 : vector<8x128xf32>
    %cst_12 = arith.constant 5.000000e-01 : f32
    %26 = vector.broadcast %cst_12 : f32 to vector<8x128xf32>
    %27 = arith.mulf %26, %21 : vector<8x128xf32>
    %28 = math.tanh %27 : vector<8x128xf32>
    %cst_13 = arith.constant 5.000000e-01 : f32
    %29 = vector.broadcast %cst_13 : f32 to vector<8x128xf32>
    %30 = arith.mulf %29, %28 : vector<8x128xf32>
    %cst_14 = arith.constant 5.000000e-01 : f32
    %31 = vector.broadcast %cst_14 : f32 to vector<8x128xf32>
    %32 = arith.addf %30, %31 : vector<8x128xf32>
    %cst_15 = arith.constant 5.000000e-01 : f32
    %33 = vector.broadcast %cst_15 : f32 to vector<8x128xf32>
    %34 = arith.mulf %33, %25 : vector<8x128xf32>
    %35 = math.tanh %34 : vector<8x128xf32>
    %cst_16 = arith.constant 5.000000e-01 : f32
    %36 = vector.broadcast %cst_16 : f32 to vector<8x128xf32>
    %37 = arith.mulf %36, %35 : vector<8x128xf32>
    %cst_17 = arith.constant 5.000000e-01 : f32
    %38 = vector.broadcast %cst_17 : f32 to vector<8x128xf32>
    %39 = arith.addf %37, %38 : vector<8x128xf32>
    %40 = vector.extract_strided_slice %15 {offsets = [0, 256], sizes = [8, 128], strides = [1, 1]} : vector<8x384xbf16> to vector<8x128xbf16>
    %41 = arith.extf %40 : vector<8x128xbf16> to vector<8x128xf32>
    %42 = vector.extract_strided_slice %17 {offsets = [0, 256], sizes = [8, 128], strides = [1, 1]} : vector<8x384xf32> to vector<8x128xf32>
    %43 = vector.broadcast %11 : vector<1x128xf32> to vector<8x128xf32>
    %44 = arith.addf %42, %43 : vector<8x128xf32>
    %45 = arith.mulf %32, %44 : vector<8x128xf32>
    %46 = arith.addf %41, %45 : vector<8x128xf32>
    %47 = math.tanh %46 : vector<8x128xf32>
    %cst_18 = arith.constant 1.000000e+00 : f32
    %48 = vector.broadcast %cst_18 : f32 to vector<8x128xf32>
    %49 = arith.subf %48, %39 : vector<8x128xf32>
    %50 = arith.mulf %49, %47 : vector<8x128xf32>
    %51 = arith.mulf %39, %12 : vector<8x128xf32>
    %52 = arith.addf %50, %51 : vector<8x128xf32>
    %c0_i32_19 = arith.constant 0 : i32
    %53 = arith.addi %13, %c0_i32_19 : i32
    %54 = vector.broadcast %53 : i32 to vector<8x1xi32>
    %55 = arith.cmpi slt, %54, %5 : vector<8x1xi32>
    %56 = arith.extui %55 : vector<8x1xi1> to vector<8x1xi32>
    %57 = arith.sitofp %56 : vector<8x1xi32> to vector<8x1xf32>
    %58 = vector.broadcast %57 : vector<8x1xf32> to vector<8x128xf32>
    %59 = arith.mulf %58, %52 : vector<8x128xf32>
    %cst_20 = arith.constant 1.000000e+00 : f32
    %60 = vector.broadcast %cst_20 : f32 to vector<8x1xf32>
    %61 = arith.subf %60, %57 : vector<8x1xf32>
    %62 = vector.broadcast %61 : vector<8x1xf32> to vector<8x128xf32>
    %63 = arith.mulf %62, %12 : vector<8x128xf32>
    %64 = arith.addf %59, %63 : vector<8x128xf32>
    %65 = arith.mulf %57, %9 : vector<8x1xf32>
    %66 = vector.broadcast %65 : vector<8x1xf32> to vector<8x128xf32>
    %67 = arith.mulf %52, %66 : vector<8x128xf32>
    %c1 = arith.constant 1 : index
    %c0_21 = arith.constant 0 : index
    %c0_22 = arith.constant 0 : index
    %68 = vector.load %arg2[%c1, %c0_21, %c0_22] : memref<10x8x384xbf16, #tpu.memory_space<vmem>>, vector<1x8x384xbf16>
    %69 = vector.shape_cast %68 : vector<1x8x384xbf16> to vector<8x384xbf16>
    %70 = arith.truncf %64 : vector<8x128xf32> to vector<8x128xbf16>
    %cst_23 = arith.constant dense<0.000000e+00> : vector<8x384xf32>
    %71 = tpu.matmul %70, %10, %cst_23 {dimension_numbers = #tpu.dot_dimension_numbers<[1], [0], [0], [1], [0, 0, 1, 1], [], []>} : vector<8x128xbf16>, vector<128x384xbf16>, vector<8x384xf32> -> vector<8x384xf32>
    %72 = vector.extract_strided_slice %69 {offsets = [0, 0], sizes = [8, 128], strides = [1, 1]} : vector<8x384xbf16> to vector<8x128xbf16>
    %73 = arith.extf %72 : vector<8x128xbf16> to vector<8x128xf32>
    %74 = vector.extract_strided_slice %71 {offsets = [0, 0], sizes = [8, 128], strides = [1, 1]} : vector<8x384xf32> to vector<8x128xf32>
    %75 = arith.addf %73, %74 : vector<8x128xf32>
    %76 = vector.extract_strided_slice %69 {offsets = [0, 128], sizes = [8, 128], strides = [1, 1]} : vector<8x384xbf16> to vector<8x128xbf16>
    %77 = arith.extf %76 : vector<8x128xbf16> to vector<8x128xf32>
    %78 = vector.extract_strided_slice %71 {offsets = [0, 128], sizes = [8, 128], strides = [1, 1]} : vector<8x384xf32> to vector<8x128xf32>
    %79 = arith.addf %77, %78 : vector<8x128xf32>
    %cst_24 = arith.constant 5.000000e-01 : f32
    %80 = vector.broadcast %cst_24 : f32 to vector<8x128xf32>
    %81 = arith.mulf %80, %75 : vector<8x128xf32>
    %82 = math.tanh %81 : vector<8x128xf32>
    %cst_25 = arith.constant 5.000000e-01 : f32
    %83 = vector.broadcast %cst_25 : f32 to vector<8x128xf32>
    %84 = arith.mulf %83, %82 : vector<8x128xf32>
    %cst_26 = arith.constant 5.000000e-01 : f32
    %85 = vector.broadcast %cst_26 : f32 to vector<8x128xf32>
    %86 = arith.addf %84, %85 : vector<8x128xf32>
    %cst_27 = arith.constant 5.000000e-01 : f32
    %87 = vector.broadcast %cst_27 : f32 to vector<8x128xf32>
    %88 = arith.mulf %87, %79 : vector<8x128xf32>
    %89 = math.tanh %88 : vector<8x128xf32>
    %cst_28 = arith.constant 5.000000e-01 : f32
    %90 = vector.broadcast %cst_28 : f32 to vector<8x128xf32>
    %91 = arith.mulf %90, %89 : vector<8x128xf32>
    %cst_29 = arith.constant 5.000000e-01 : f32
    %92 = vector.broadcast %cst_29 : f32 to vector<8x128xf32>
    %93 = arith.addf %91, %92 : vector<8x128xf32>
    %94 = vector.extract_strided_slice %69 {offsets = [0, 256], sizes = [8, 128], strides = [1, 1]} : vector<8x384xbf16> to vector<8x128xbf16>
    %95 = arith.extf %94 : vector<8x128xbf16> to vector<8x128xf32>
    %96 = vector.extract_strided_slice %71 {offsets = [0, 256], sizes = [8, 128], strides = [1, 1]} : vector<8x384xf32> to vector<8x128xf32>
    %97 = vector.broadcast %11 : vector<1x128xf32> to vector<8x128xf32>
    %98 = arith.addf %96, %97 : vector<8x128xf32>
    %99 = arith.mulf %86, %98 : vector<8x128xf32>
    %100 = arith.addf %95, %99 : vector<8x128xf32>
    %101 = math.tanh %100 : vector<8x128xf32>
    %cst_30 = arith.constant 1.000000e+00 : f32
    %102 = vector.broadcast %cst_30 : f32 to vector<8x128xf32>
    %103 = arith.subf %102, %93 : vector<8x128xf32>
    %104 = arith.mulf %103, %101 : vector<8x128xf32>
    %105 = arith.mulf %93, %64 : vector<8x128xf32>
    %106 = arith.addf %104, %105 : vector<8x128xf32>
    %c1_i32_31 = arith.constant 1 : i32
    %107 = arith.addi %13, %c1_i32_31 : i32
    %108 = vector.broadcast %107 : i32 to vector<8x1xi32>
    %109 = arith.cmpi slt, %108, %5 : vector<8x1xi32>
    %110 = arith.extui %109 : vector<8x1xi1> to vector<8x1xi32>
    %111 = arith.sitofp %110 : vector<8x1xi32> to vector<8x1xf32>
    %112 = vector.broadcast %111 : vector<8x1xf32> to vector<8x128xf32>
    %113 = arith.mulf %112, %106 : vector<8x128xf32>
    %cst_32 = arith.constant 1.000000e+00 : f32
    %114 = vector.broadcast %cst_32 : f32 to vector<8x1xf32>
    %115 = arith.subf %114, %111 : vector<8x1xf32>
    %116 = vector.broadcast %115 : vector<8x1xf32> to vector<8x128xf32>
    %117 = arith.mulf %116, %64 : vector<8x128xf32>
    %118 = arith.addf %113, %117 : vector<8x128xf32>
    %119 = arith.mulf %111, %9 : vector<8x1xf32>
    %120 = vector.broadcast %119 : vector<8x1xf32> to vector<8x128xf32>
    %121 = arith.mulf %106, %120 : vector<8x128xf32>
    %c2 = arith.constant 2 : index
    %c0_33 = arith.constant 0 : index
    %c0_34 = arith.constant 0 : index
    %122 = vector.load %arg2[%c2, %c0_33, %c0_34] : memref<10x8x384xbf16, #tpu.memory_space<vmem>>, vector<1x8x384xbf16>
    %123 = vector.shape_cast %122 : vector<1x8x384xbf16> to vector<8x384xbf16>
    %124 = arith.truncf %118 : vector<8x128xf32> to vector<8x128xbf16>
    %cst_35 = arith.constant dense<0.000000e+00> : vector<8x384xf32>
    %125 = tpu.matmul %124, %10, %cst_35 {dimension_numbers = #tpu.dot_dimension_numbers<[1], [0], [0], [1], [0, 0, 1, 1], [], []>} : vector<8x128xbf16>, vector<128x384xbf16>, vector<8x384xf32> -> vector<8x384xf32>
    %126 = vector.extract_strided_slice %123 {offsets = [0, 0], sizes = [8, 128], strides = [1, 1]} : vector<8x384xbf16> to vector<8x128xbf16>
    %127 = arith.extf %126 : vector<8x128xbf16> to vector<8x128xf32>
    %128 = vector.extract_strided_slice %125 {offsets = [0, 0], sizes = [8, 128], strides = [1, 1]} : vector<8x384xf32> to vector<8x128xf32>
    %129 = arith.addf %127, %128 : vector<8x128xf32>
    %130 = vector.extract_strided_slice %123 {offsets = [0, 128], sizes = [8, 128], strides = [1, 1]} : vector<8x384xbf16> to vector<8x128xbf16>
    %131 = arith.extf %130 : vector<8x128xbf16> to vector<8x128xf32>
    %132 = vector.extract_strided_slice %125 {offsets = [0, 128], sizes = [8, 128], strides = [1, 1]} : vector<8x384xf32> to vector<8x128xf32>
    %133 = arith.addf %131, %132 : vector<8x128xf32>
    %cst_36 = arith.constant 5.000000e-01 : f32
    %134 = vector.broadcast %cst_36 : f32 to vector<8x128xf32>
    %135 = arith.mulf %134, %129 : vector<8x128xf32>
    %136 = math.tanh %135 : vector<8x128xf32>
    %cst_37 = arith.constant 5.000000e-01 : f32
    %137 = vector.broadcast %cst_37 : f32 to vector<8x128xf32>
    %138 = arith.mulf %137, %136 : vector<8x128xf32>
    %cst_38 = arith.constant 5.000000e-01 : f32
    %139 = vector.broadcast %cst_38 : f32 to vector<8x128xf32>
    %140 = arith.addf %138, %139 : vector<8x128xf32>
    %cst_39 = arith.constant 5.000000e-01 : f32
    %141 = vector.broadcast %cst_39 : f32 to vector<8x128xf32>
    %142 = arith.mulf %141, %133 : vector<8x128xf32>
    %143 = math.tanh %142 : vector<8x128xf32>
    %cst_40 = arith.constant 5.000000e-01 : f32
    %144 = vector.broadcast %cst_40 : f32 to vector<8x128xf32>
    %145 = arith.mulf %144, %143 : vector<8x128xf32>
    %cst_41 = arith.constant 5.000000e-01 : f32
    %146 = vector.broadcast %cst_41 : f32 to vector<8x128xf32>
    %147 = arith.addf %145, %146 : vector<8x128xf32>
    %148 = vector.extract_strided_slice %123 {offsets = [0, 256], sizes = [8, 128], strides = [1, 1]} : vector<8x384xbf16> to vector<8x128xbf16>
    %149 = arith.extf %148 : vector<8x128xbf16> to vector<8x128xf32>
    %150 = vector.extract_strided_slice %125 {offsets = [0, 256], sizes = [8, 128], strides = [1, 1]} : vector<8x384xf32> to vector<8x128xf32>
    %151 = vector.broadcast %11 : vector<1x128xf32> to vector<8x128xf32>
    %152 = arith.addf %150, %151 : vector<8x128xf32>
    %153 = arith.mulf %140, %152 : vector<8x128xf32>
    %154 = arith.addf %149, %153 : vector<8x128xf32>
    %155 = math.tanh %154 : vector<8x128xf32>
    %cst_42 = arith.constant 1.000000e+00 : f32
    %156 = vector.broadcast %cst_42 : f32 to vector<8x128xf32>
    %157 = arith.subf %156, %147 : vector<8x128xf32>
    %158 = arith.mulf %157, %155 : vector<8x128xf32>
    %159 = arith.mulf %147, %118 : vector<8x128xf32>
    %160 = arith.addf %158, %159 : vector<8x128xf32>
    %c2_i32 = arith.constant 2 : i32
    %161 = arith.addi %13, %c2_i32 : i32
    %162 = vector.broadcast %161 : i32 to vector<8x1xi32>
    %163 = arith.cmpi slt, %162, %5 : vector<8x1xi32>
    %164 = arith.extui %163 : vector<8x1xi1> to vector<8x1xi32>
    %165 = arith.sitofp %164 : vector<8x1xi32> to vector<8x1xf32>
    %166 = vector.broadcast %165 : vector<8x1xf32> to vector<8x128xf32>
    %167 = arith.mulf %166, %160 : vector<8x128xf32>
    %cst_43 = arith.constant 1.000000e+00 : f32
    %168 = vector.broadcast %cst_43 : f32 to vector<8x1xf32>
    %169 = arith.subf %168, %165 : vector<8x1xf32>
    %170 = vector.broadcast %169 : vector<8x1xf32> to vector<8x128xf32>
    %171 = arith.mulf %170, %118 : vector<8x128xf32>
    %172 = arith.addf %167, %171 : vector<8x128xf32>
    %173 = arith.mulf %165, %9 : vector<8x1xf32>
    %174 = vector.broadcast %173 : vector<8x1xf32> to vector<8x128xf32>
    %175 = arith.mulf %160, %174 : vector<8x128xf32>
    %c3 = arith.constant 3 : index
    %c0_44 = arith.constant 0 : index
    %c0_45 = arith.constant 0 : index
    %176 = vector.load %arg2[%c3, %c0_44, %c0_45] : memref<10x8x384xbf16, #tpu.memory_space<vmem>>, vector<1x8x384xbf16>
    %177 = vector.shape_cast %176 : vector<1x8x384xbf16> to vector<8x384xbf16>
    %178 = arith.truncf %172 : vector<8x128xf32> to vector<8x128xbf16>
    %cst_46 = arith.constant dense<0.000000e+00> : vector<8x384xf32>
    %179 = tpu.matmul %178, %10, %cst_46 {dimension_numbers = #tpu.dot_dimension_numbers<[1], [0], [0], [1], [0, 0, 1, 1], [], []>} : vector<8x128xbf16>, vector<128x384xbf16>, vector<8x384xf32> -> vector<8x384xf32>
    %180 = vector.extract_strided_slice %177 {offsets = [0, 0], sizes = [8, 128], strides = [1, 1]} : vector<8x384xbf16> to vector<8x128xbf16>
    %181 = arith.extf %180 : vector<8x128xbf16> to vector<8x128xf32>
    %182 = vector.extract_strided_slice %179 {offsets = [0, 0], sizes = [8, 128], strides = [1, 1]} : vector<8x384xf32> to vector<8x128xf32>
    %183 = arith.addf %181, %182 : vector<8x128xf32>
    %184 = vector.extract_strided_slice %177 {offsets = [0, 128], sizes = [8, 128], strides = [1, 1]} : vector<8x384xbf16> to vector<8x128xbf16>
    %185 = arith.extf %184 : vector<8x128xbf16> to vector<8x128xf32>
    %186 = vector.extract_strided_slice %179 {offsets = [0, 128], sizes = [8, 128], strides = [1, 1]} : vector<8x384xf32> to vector<8x128xf32>
    %187 = arith.addf %185, %186 : vector<8x128xf32>
    %cst_47 = arith.constant 5.000000e-01 : f32
    %188 = vector.broadcast %cst_47 : f32 to vector<8x128xf32>
    %189 = arith.mulf %188, %183 : vector<8x128xf32>
    %190 = math.tanh %189 : vector<8x128xf32>
    %cst_48 = arith.constant 5.000000e-01 : f32
    %191 = vector.broadcast %cst_48 : f32 to vector<8x128xf32>
    %192 = arith.mulf %191, %190 : vector<8x128xf32>
    %cst_49 = arith.constant 5.000000e-01 : f32
    %193 = vector.broadcast %cst_49 : f32 to vector<8x128xf32>
    %194 = arith.addf %192, %193 : vector<8x128xf32>
    %cst_50 = arith.constant 5.000000e-01 : f32
    %195 = vector.broadcast %cst_50 : f32 to vector<8x128xf32>
    %196 = arith.mulf %195, %187 : vector<8x128xf32>
    %197 = math.tanh %196 : vector<8x128xf32>
    %cst_51 = arith.constant 5.000000e-01 : f32
    %198 = vector.broadcast %cst_51 : f32 to vector<8x128xf32>
    %199 = arith.mulf %198, %197 : vector<8x128xf32>
    %cst_52 = arith.constant 5.000000e-01 : f32
    %200 = vector.broadcast %cst_52 : f32 to vector<8x128xf32>
    %201 = arith.addf %199, %200 : vector<8x128xf32>
    %202 = vector.extract_strided_slice %177 {offsets = [0, 256], sizes = [8, 128], strides = [1, 1]} : vector<8x384xbf16> to vector<8x128xbf16>
    %203 = arith.extf %202 : vector<8x128xbf16> to vector<8x128xf32>
    %204 = vector.extract_strided_slice %179 {offsets = [0, 256], sizes = [8, 128], strides = [1, 1]} : vector<8x384xf32> to vector<8x128xf32>
    %205 = vector.broadcast %11 : vector<1x128xf32> to vector<8x128xf32>
    %206 = arith.addf %204, %205 : vector<8x128xf32>
    %207 = arith.mulf %194, %206 : vector<8x128xf32>
    %208 = arith.addf %203, %207 : vector<8x128xf32>
    %209 = math.tanh %208 : vector<8x128xf32>
    %cst_53 = arith.constant 1.000000e+00 : f32
    %210 = vector.broadcast %cst_53 : f32 to vector<8x128xf32>
    %211 = arith.subf %210, %201 : vector<8x128xf32>
    %212 = arith.mulf %211, %209 : vector<8x128xf32>
    %213 = arith.mulf %201, %172 : vector<8x128xf32>
    %214 = arith.addf %212, %213 : vector<8x128xf32>
    %c3_i32 = arith.constant 3 : i32
    %215 = arith.addi %13, %c3_i32 : i32
    %216 = vector.broadcast %215 : i32 to vector<8x1xi32>
    %217 = arith.cmpi slt, %216, %5 : vector<8x1xi32>
    %218 = arith.extui %217 : vector<8x1xi1> to vector<8x1xi32>
    %219 = arith.sitofp %218 : vector<8x1xi32> to vector<8x1xf32>
    %220 = vector.broadcast %219 : vector<8x1xf32> to vector<8x128xf32>
    %221 = arith.mulf %220, %214 : vector<8x128xf32>
    %cst_54 = arith.constant 1.000000e+00 : f32
    %222 = vector.broadcast %cst_54 : f32 to vector<8x1xf32>
    %223 = arith.subf %222, %219 : vector<8x1xf32>
    %224 = vector.broadcast %223 : vector<8x1xf32> to vector<8x128xf32>
    %225 = arith.mulf %224, %172 : vector<8x128xf32>
    %226 = arith.addf %221, %225 : vector<8x128xf32>
    %227 = arith.mulf %219, %9 : vector<8x1xf32>
    %228 = vector.broadcast %227 : vector<8x1xf32> to vector<8x128xf32>
    %229 = arith.mulf %214, %228 : vector<8x128xf32>
    %c4 = arith.constant 4 : index
    %c0_55 = arith.constant 0 : index
    %c0_56 = arith.constant 0 : index
    %230 = vector.load %arg2[%c4, %c0_55, %c0_56] : memref<10x8x384xbf16, #tpu.memory_space<vmem>>, vector<1x8x384xbf16>
    %231 = vector.shape_cast %230 : vector<1x8x384xbf16> to vector<8x384xbf16>
    %232 = arith.truncf %226 : vector<8x128xf32> to vector<8x128xbf16>
    %cst_57 = arith.constant dense<0.000000e+00> : vector<8x384xf32>
    %233 = tpu.matmul %232, %10, %cst_57 {dimension_numbers = #tpu.dot_dimension_numbers<[1], [0], [0], [1], [0, 0, 1, 1], [], []>} : vector<8x128xbf16>, vector<128x384xbf16>, vector<8x384xf32> -> vector<8x384xf32>
    %234 = vector.extract_strided_slice %231 {offsets = [0, 0], sizes = [8, 128], strides = [1, 1]} : vector<8x384xbf16> to vector<8x128xbf16>
    %235 = arith.extf %234 : vector<8x128xbf16> to vector<8x128xf32>
    %236 = vector.extract_strided_slice %233 {offsets = [0, 0], sizes = [8, 128], strides = [1, 1]} : vector<8x384xf32> to vector<8x128xf32>
    %237 = arith.addf %235, %236 : vector<8x128xf32>
    %238 = vector.extract_strided_slice %231 {offsets = [0, 128], sizes = [8, 128], strides = [1, 1]} : vector<8x384xbf16> to vector<8x128xbf16>
    %239 = arith.extf %238 : vector<8x128xbf16> to vector<8x128xf32>
    %240 = vector.extract_strided_slice %233 {offsets = [0, 128], sizes = [8, 128], strides = [1, 1]} : vector<8x384xf32> to vector<8x128xf32>
    %241 = arith.addf %239, %240 : vector<8x128xf32>
    %cst_58 = arith.constant 5.000000e-01 : f32
    %242 = vector.broadcast %cst_58 : f32 to vector<8x128xf32>
    %243 = arith.mulf %242, %237 : vector<8x128xf32>
    %244 = math.tanh %243 : vector<8x128xf32>
    %cst_59 = arith.constant 5.000000e-01 : f32
    %245 = vector.broadcast %cst_59 : f32 to vector<8x128xf32>
    %246 = arith.mulf %245, %244 : vector<8x128xf32>
    %cst_60 = arith.constant 5.000000e-01 : f32
    %247 = vector.broadcast %cst_60 : f32 to vector<8x128xf32>
    %248 = arith.addf %246, %247 : vector<8x128xf32>
    %cst_61 = arith.constant 5.000000e-01 : f32
    %249 = vector.broadcast %cst_61 : f32 to vector<8x128xf32>
    %250 = arith.mulf %249, %241 : vector<8x128xf32>
    %251 = math.tanh %250 : vector<8x128xf32>
    %cst_62 = arith.constant 5.000000e-01 : f32
    %252 = vector.broadcast %cst_62 : f32 to vector<8x128xf32>
    %253 = arith.mulf %252, %251 : vector<8x128xf32>
    %cst_63 = arith.constant 5.000000e-01 : f32
    %254 = vector.broadcast %cst_63 : f32 to vector<8x128xf32>
    %255 = arith.addf %253, %254 : vector<8x128xf32>
    %256 = vector.extract_strided_slice %231 {offsets = [0, 256], sizes = [8, 128], strides = [1, 1]} : vector<8x384xbf16> to vector<8x128xbf16>
    %257 = arith.extf %256 : vector<8x128xbf16> to vector<8x128xf32>
    %258 = vector.extract_strided_slice %233 {offsets = [0, 256], sizes = [8, 128], strides = [1, 1]} : vector<8x384xf32> to vector<8x128xf32>
    %259 = vector.broadcast %11 : vector<1x128xf32> to vector<8x128xf32>
    %260 = arith.addf %258, %259 : vector<8x128xf32>
    %261 = arith.mulf %248, %260 : vector<8x128xf32>
    %262 = arith.addf %257, %261 : vector<8x128xf32>
    %263 = math.tanh %262 : vector<8x128xf32>
    %cst_64 = arith.constant 1.000000e+00 : f32
    %264 = vector.broadcast %cst_64 : f32 to vector<8x128xf32>
    %265 = arith.subf %264, %255 : vector<8x128xf32>
    %266 = arith.mulf %265, %263 : vector<8x128xf32>
    %267 = arith.mulf %255, %226 : vector<8x128xf32>
    %268 = arith.addf %266, %267 : vector<8x128xf32>
    %c4_i32 = arith.constant 4 : i32
    %269 = arith.addi %13, %c4_i32 : i32
    %270 = vector.broadcast %269 : i32 to vector<8x1xi32>
    %271 = arith.cmpi slt, %270, %5 : vector<8x1xi32>
    %272 = arith.extui %271 : vector<8x1xi1> to vector<8x1xi32>
    %273 = arith.sitofp %272 : vector<8x1xi32> to vector<8x1xf32>
    %274 = vector.broadcast %273 : vector<8x1xf32> to vector<8x128xf32>
    %275 = arith.mulf %274, %268 : vector<8x128xf32>
    %cst_65 = arith.constant 1.000000e+00 : f32
    %276 = vector.broadcast %cst_65 : f32 to vector<8x1xf32>
    %277 = arith.subf %276, %273 : vector<8x1xf32>
    %278 = vector.broadcast %277 : vector<8x1xf32> to vector<8x128xf32>
    %279 = arith.mulf %278, %226 : vector<8x128xf32>
    %280 = arith.addf %275, %279 : vector<8x128xf32>
    %281 = arith.mulf %273, %9 : vector<8x1xf32>
    %282 = vector.broadcast %281 : vector<8x1xf32> to vector<8x128xf32>
    %283 = arith.mulf %268, %282 : vector<8x128xf32>
    %c5 = arith.constant 5 : index
    %c0_66 = arith.constant 0 : index
    %c0_67 = arith.constant 0 : index
    %284 = vector.load %arg2[%c5, %c0_66, %c0_67] : memref<10x8x384xbf16, #tpu.memory_space<vmem>>, vector<1x8x384xbf16>
    %285 = vector.shape_cast %284 : vector<1x8x384xbf16> to vector<8x384xbf16>
    %286 = arith.truncf %280 : vector<8x128xf32> to vector<8x128xbf16>
    %cst_68 = arith.constant dense<0.000000e+00> : vector<8x384xf32>
    %287 = tpu.matmul %286, %10, %cst_68 {dimension_numbers = #tpu.dot_dimension_numbers<[1], [0], [0], [1], [0, 0, 1, 1], [], []>} : vector<8x128xbf16>, vector<128x384xbf16>, vector<8x384xf32> -> vector<8x384xf32>
    %288 = vector.extract_strided_slice %285 {offsets = [0, 0], sizes = [8, 128], strides = [1, 1]} : vector<8x384xbf16> to vector<8x128xbf16>
    %289 = arith.extf %288 : vector<8x128xbf16> to vector<8x128xf32>
    %290 = vector.extract_strided_slice %287 {offsets = [0, 0], sizes = [8, 128], strides = [1, 1]} : vector<8x384xf32> to vector<8x128xf32>
    %291 = arith.addf %289, %290 : vector<8x128xf32>
    %292 = vector.extract_strided_slice %285 {offsets = [0, 128], sizes = [8, 128], strides = [1, 1]} : vector<8x384xbf16> to vector<8x128xbf16>
    %293 = arith.extf %292 : vector<8x128xbf16> to vector<8x128xf32>
    %294 = vector.extract_strided_slice %287 {offsets = [0, 128], sizes = [8, 128], strides = [1, 1]} : vector<8x384xf32> to vector<8x128xf32>
    %295 = arith.addf %293, %294 : vector<8x128xf32>
    %cst_69 = arith.constant 5.000000e-01 : f32
    %296 = vector.broadcast %cst_69 : f32 to vector<8x128xf32>
    %297 = arith.mulf %296, %291 : vector<8x128xf32>
    %298 = math.tanh %297 : vector<8x128xf32>
    %cst_70 = arith.constant 5.000000e-01 : f32
    %299 = vector.broadcast %cst_70 : f32 to vector<8x128xf32>
    %300 = arith.mulf %299, %298 : vector<8x128xf32>
    %cst_71 = arith.constant 5.000000e-01 : f32
    %301 = vector.broadcast %cst_71 : f32 to vector<8x128xf32>
    %302 = arith.addf %300, %301 : vector<8x128xf32>
    %cst_72 = arith.constant 5.000000e-01 : f32
    %303 = vector.broadcast %cst_72 : f32 to vector<8x128xf32>
    %304 = arith.mulf %303, %295 : vector<8x128xf32>
    %305 = math.tanh %304 : vector<8x128xf32>
    %cst_73 = arith.constant 5.000000e-01 : f32
    %306 = vector.broadcast %cst_73 : f32 to vector<8x128xf32>
    %307 = arith.mulf %306, %305 : vector<8x128xf32>
    %cst_74 = arith.constant 5.000000e-01 : f32
    %308 = vector.broadcast %cst_74 : f32 to vector<8x128xf32>
    %309 = arith.addf %307, %308 : vector<8x128xf32>
    %310 = vector.extract_strided_slice %285 {offsets = [0, 256], sizes = [8, 128], strides = [1, 1]} : vector<8x384xbf16> to vector<8x128xbf16>
    %311 = arith.extf %310 : vector<8x128xbf16> to vector<8x128xf32>
    %312 = vector.extract_strided_slice %287 {offsets = [0, 256], sizes = [8, 128], strides = [1, 1]} : vector<8x384xf32> to vector<8x128xf32>
    %313 = vector.broadcast %11 : vector<1x128xf32> to vector<8x128xf32>
    %314 = arith.addf %312, %313 : vector<8x128xf32>
    %315 = arith.mulf %302, %314 : vector<8x128xf32>
    %316 = arith.addf %311, %315 : vector<8x128xf32>
    %317 = math.tanh %316 : vector<8x128xf32>
    %cst_75 = arith.constant 1.000000e+00 : f32
    %318 = vector.broadcast %cst_75 : f32 to vector<8x128xf32>
    %319 = arith.subf %318, %309 : vector<8x128xf32>
    %320 = arith.mulf %319, %317 : vector<8x128xf32>
    %321 = arith.mulf %309, %280 : vector<8x128xf32>
    %322 = arith.addf %320, %321 : vector<8x128xf32>
    %c5_i32 = arith.constant 5 : i32
    %323 = arith.addi %13, %c5_i32 : i32
    %324 = vector.broadcast %323 : i32 to vector<8x1xi32>
    %325 = arith.cmpi slt, %324, %5 : vector<8x1xi32>
    %326 = arith.extui %325 : vector<8x1xi1> to vector<8x1xi32>
    %327 = arith.sitofp %326 : vector<8x1xi32> to vector<8x1xf32>
    %328 = vector.broadcast %327 : vector<8x1xf32> to vector<8x128xf32>
    %329 = arith.mulf %328, %322 : vector<8x128xf32>
    %cst_76 = arith.constant 1.000000e+00 : f32
    %330 = vector.broadcast %cst_76 : f32 to vector<8x1xf32>
    %331 = arith.subf %330, %327 : vector<8x1xf32>
    %332 = vector.broadcast %331 : vector<8x1xf32> to vector<8x128xf32>
    %333 = arith.mulf %332, %280 : vector<8x128xf32>
    %334 = arith.addf %329, %333 : vector<8x128xf32>
    %335 = arith.mulf %327, %9 : vector<8x1xf32>
    %336 = vector.broadcast %335 : vector<8x1xf32> to vector<8x128xf32>
    %337 = arith.mulf %322, %336 : vector<8x128xf32>
    %c6 = arith.constant 6 : index
    %c0_77 = arith.constant 0 : index
    %c0_78 = arith.constant 0 : index
    %338 = vector.load %arg2[%c6, %c0_77, %c0_78] : memref<10x8x384xbf16, #tpu.memory_space<vmem>>, vector<1x8x384xbf16>
    %339 = vector.shape_cast %338 : vector<1x8x384xbf16> to vector<8x384xbf16>
    %340 = arith.truncf %334 : vector<8x128xf32> to vector<8x128xbf16>
    %cst_79 = arith.constant dense<0.000000e+00> : vector<8x384xf32>
    %341 = tpu.matmul %340, %10, %cst_79 {dimension_numbers = #tpu.dot_dimension_numbers<[1], [0], [0], [1], [0, 0, 1, 1], [], []>} : vector<8x128xbf16>, vector<128x384xbf16>, vector<8x384xf32> -> vector<8x384xf32>
    %342 = vector.extract_strided_slice %339 {offsets = [0, 0], sizes = [8, 128], strides = [1, 1]} : vector<8x384xbf16> to vector<8x128xbf16>
    %343 = arith.extf %342 : vector<8x128xbf16> to vector<8x128xf32>
    %344 = vector.extract_strided_slice %341 {offsets = [0, 0], sizes = [8, 128], strides = [1, 1]} : vector<8x384xf32> to vector<8x128xf32>
    %345 = arith.addf %343, %344 : vector<8x128xf32>
    %346 = vector.extract_strided_slice %339 {offsets = [0, 128], sizes = [8, 128], strides = [1, 1]} : vector<8x384xbf16> to vector<8x128xbf16>
    %347 = arith.extf %346 : vector<8x128xbf16> to vector<8x128xf32>
    %348 = vector.extract_strided_slice %341 {offsets = [0, 128], sizes = [8, 128], strides = [1, 1]} : vector<8x384xf32> to vector<8x128xf32>
    %349 = arith.addf %347, %348 : vector<8x128xf32>
    %cst_80 = arith.constant 5.000000e-01 : f32
    %350 = vector.broadcast %cst_80 : f32 to vector<8x128xf32>
    %351 = arith.mulf %350, %345 : vector<8x128xf32>
    %352 = math.tanh %351 : vector<8x128xf32>
    %cst_81 = arith.constant 5.000000e-01 : f32
    %353 = vector.broadcast %cst_81 : f32 to vector<8x128xf32>
    %354 = arith.mulf %353, %352 : vector<8x128xf32>
    %cst_82 = arith.constant 5.000000e-01 : f32
    %355 = vector.broadcast %cst_82 : f32 to vector<8x128xf32>
    %356 = arith.addf %354, %355 : vector<8x128xf32>
    %cst_83 = arith.constant 5.000000e-01 : f32
    %357 = vector.broadcast %cst_83 : f32 to vector<8x128xf32>
    %358 = arith.mulf %357, %349 : vector<8x128xf32>
    %359 = math.tanh %358 : vector<8x128xf32>
    %cst_84 = arith.constant 5.000000e-01 : f32
    %360 = vector.broadcast %cst_84 : f32 to vector<8x128xf32>
    %361 = arith.mulf %360, %359 : vector<8x128xf32>
    %cst_85 = arith.constant 5.000000e-01 : f32
    %362 = vector.broadcast %cst_85 : f32 to vector<8x128xf32>
    %363 = arith.addf %361, %362 : vector<8x128xf32>
    %364 = vector.extract_strided_slice %339 {offsets = [0, 256], sizes = [8, 128], strides = [1, 1]} : vector<8x384xbf16> to vector<8x128xbf16>
    %365 = arith.extf %364 : vector<8x128xbf16> to vector<8x128xf32>
    %366 = vector.extract_strided_slice %341 {offsets = [0, 256], sizes = [8, 128], strides = [1, 1]} : vector<8x384xf32> to vector<8x128xf32>
    %367 = vector.broadcast %11 : vector<1x128xf32> to vector<8x128xf32>
    %368 = arith.addf %366, %367 : vector<8x128xf32>
    %369 = arith.mulf %356, %368 : vector<8x128xf32>
    %370 = arith.addf %365, %369 : vector<8x128xf32>
    %371 = math.tanh %370 : vector<8x128xf32>
    %cst_86 = arith.constant 1.000000e+00 : f32
    %372 = vector.broadcast %cst_86 : f32 to vector<8x128xf32>
    %373 = arith.subf %372, %363 : vector<8x128xf32>
    %374 = arith.mulf %373, %371 : vector<8x128xf32>
    %375 = arith.mulf %363, %334 : vector<8x128xf32>
    %376 = arith.addf %374, %375 : vector<8x128xf32>
    %c6_i32 = arith.constant 6 : i32
    %377 = arith.addi %13, %c6_i32 : i32
    %378 = vector.broadcast %377 : i32 to vector<8x1xi32>
    %379 = arith.cmpi slt, %378, %5 : vector<8x1xi32>
    %380 = arith.extui %379 : vector<8x1xi1> to vector<8x1xi32>
    %381 = arith.sitofp %380 : vector<8x1xi32> to vector<8x1xf32>
    %382 = vector.broadcast %381 : vector<8x1xf32> to vector<8x128xf32>
    %383 = arith.mulf %382, %376 : vector<8x128xf32>
    %cst_87 = arith.constant 1.000000e+00 : f32
    %384 = vector.broadcast %cst_87 : f32 to vector<8x1xf32>
    %385 = arith.subf %384, %381 : vector<8x1xf32>
    %386 = vector.broadcast %385 : vector<8x1xf32> to vector<8x128xf32>
    %387 = arith.mulf %386, %334 : vector<8x128xf32>
    %388 = arith.addf %383, %387 : vector<8x128xf32>
    %389 = arith.mulf %381, %9 : vector<8x1xf32>
    %390 = vector.broadcast %389 : vector<8x1xf32> to vector<8x128xf32>
    %391 = arith.mulf %376, %390 : vector<8x128xf32>
    %c7 = arith.constant 7 : index
    %c0_88 = arith.constant 0 : index
    %c0_89 = arith.constant 0 : index
    %392 = vector.load %arg2[%c7, %c0_88, %c0_89] : memref<10x8x384xbf16, #tpu.memory_space<vmem>>, vector<1x8x384xbf16>
    %393 = vector.shape_cast %392 : vector<1x8x384xbf16> to vector<8x384xbf16>
    %394 = arith.truncf %388 : vector<8x128xf32> to vector<8x128xbf16>
    %cst_90 = arith.constant dense<0.000000e+00> : vector<8x384xf32>
    %395 = tpu.matmul %394, %10, %cst_90 {dimension_numbers = #tpu.dot_dimension_numbers<[1], [0], [0], [1], [0, 0, 1, 1], [], []>} : vector<8x128xbf16>, vector<128x384xbf16>, vector<8x384xf32> -> vector<8x384xf32>
    %396 = vector.extract_strided_slice %393 {offsets = [0, 0], sizes = [8, 128], strides = [1, 1]} : vector<8x384xbf16> to vector<8x128xbf16>
    %397 = arith.extf %396 : vector<8x128xbf16> to vector<8x128xf32>
    %398 = vector.extract_strided_slice %395 {offsets = [0, 0], sizes = [8, 128], strides = [1, 1]} : vector<8x384xf32> to vector<8x128xf32>
    %399 = arith.addf %397, %398 : vector<8x128xf32>
    %400 = vector.extract_strided_slice %393 {offsets = [0, 128], sizes = [8, 128], strides = [1, 1]} : vector<8x384xbf16> to vector<8x128xbf16>
    %401 = arith.extf %400 : vector<8x128xbf16> to vector<8x128xf32>
    %402 = vector.extract_strided_slice %395 {offsets = [0, 128], sizes = [8, 128], strides = [1, 1]} : vector<8x384xf32> to vector<8x128xf32>
    %403 = arith.addf %401, %402 : vector<8x128xf32>
    %cst_91 = arith.constant 5.000000e-01 : f32
    %404 = vector.broadcast %cst_91 : f32 to vector<8x128xf32>
    %405 = arith.mulf %404, %399 : vector<8x128xf32>
    %406 = math.tanh %405 : vector<8x128xf32>
    %cst_92 = arith.constant 5.000000e-01 : f32
    %407 = vector.broadcast %cst_92 : f32 to vector<8x128xf32>
    %408 = arith.mulf %407, %406 : vector<8x128xf32>
    %cst_93 = arith.constant 5.000000e-01 : f32
    %409 = vector.broadcast %cst_93 : f32 to vector<8x128xf32>
    %410 = arith.addf %408, %409 : vector<8x128xf32>
    %cst_94 = arith.constant 5.000000e-01 : f32
    %411 = vector.broadcast %cst_94 : f32 to vector<8x128xf32>
    %412 = arith.mulf %411, %403 : vector<8x128xf32>
    %413 = math.tanh %412 : vector<8x128xf32>
    %cst_95 = arith.constant 5.000000e-01 : f32
    %414 = vector.broadcast %cst_95 : f32 to vector<8x128xf32>
    %415 = arith.mulf %414, %413 : vector<8x128xf32>
    %cst_96 = arith.constant 5.000000e-01 : f32
    %416 = vector.broadcast %cst_96 : f32 to vector<8x128xf32>
    %417 = arith.addf %415, %416 : vector<8x128xf32>
    %418 = vector.extract_strided_slice %393 {offsets = [0, 256], sizes = [8, 128], strides = [1, 1]} : vector<8x384xbf16> to vector<8x128xbf16>
    %419 = arith.extf %418 : vector<8x128xbf16> to vector<8x128xf32>
    %420 = vector.extract_strided_slice %395 {offsets = [0, 256], sizes = [8, 128], strides = [1, 1]} : vector<8x384xf32> to vector<8x128xf32>
    %421 = vector.broadcast %11 : vector<1x128xf32> to vector<8x128xf32>
    %422 = arith.addf %420, %421 : vector<8x128xf32>
    %423 = arith.mulf %410, %422 : vector<8x128xf32>
    %424 = arith.addf %419, %423 : vector<8x128xf32>
    %425 = math.tanh %424 : vector<8x128xf32>
    %cst_97 = arith.constant 1.000000e+00 : f32
    %426 = vector.broadcast %cst_97 : f32 to vector<8x128xf32>
    %427 = arith.subf %426, %417 : vector<8x128xf32>
    %428 = arith.mulf %427, %425 : vector<8x128xf32>
    %429 = arith.mulf %417, %388 : vector<8x128xf32>
    %430 = arith.addf %428, %429 : vector<8x128xf32>
    %c7_i32 = arith.constant 7 : i32
    %431 = arith.addi %13, %c7_i32 : i32
    %432 = vector.broadcast %431 : i32 to vector<8x1xi32>
    %433 = arith.cmpi slt, %432, %5 : vector<8x1xi32>
    %434 = arith.extui %433 : vector<8x1xi1> to vector<8x1xi32>
    %435 = arith.sitofp %434 : vector<8x1xi32> to vector<8x1xf32>
    %436 = vector.broadcast %435 : vector<8x1xf32> to vector<8x128xf32>
    %437 = arith.mulf %436, %430 : vector<8x128xf32>
    %cst_98 = arith.constant 1.000000e+00 : f32
    %438 = vector.broadcast %cst_98 : f32 to vector<8x1xf32>
    %439 = arith.subf %438, %435 : vector<8x1xf32>
    %440 = vector.broadcast %439 : vector<8x1xf32> to vector<8x128xf32>
    %441 = arith.mulf %440, %388 : vector<8x128xf32>
    %442 = arith.addf %437, %441 : vector<8x128xf32>
    %443 = arith.mulf %435, %9 : vector<8x1xf32>
    %444 = vector.broadcast %443 : vector<8x1xf32> to vector<8x128xf32>
    %445 = arith.mulf %430, %444 : vector<8x128xf32>
    %c8 = arith.constant 8 : index
    %c0_99 = arith.constant 0 : index
    %c0_100 = arith.constant 0 : index
    %446 = vector.load %arg2[%c8, %c0_99, %c0_100] : memref<10x8x384xbf16, #tpu.memory_space<vmem>>, vector<1x8x384xbf16>
    %447 = vector.shape_cast %446 : vector<1x8x384xbf16> to vector<8x384xbf16>
    %448 = arith.truncf %442 : vector<8x128xf32> to vector<8x128xbf16>
    %cst_101 = arith.constant dense<0.000000e+00> : vector<8x384xf32>
    %449 = tpu.matmul %448, %10, %cst_101 {dimension_numbers = #tpu.dot_dimension_numbers<[1], [0], [0], [1], [0, 0, 1, 1], [], []>} : vector<8x128xbf16>, vector<128x384xbf16>, vector<8x384xf32> -> vector<8x384xf32>
    %450 = vector.extract_strided_slice %447 {offsets = [0, 0], sizes = [8, 128], strides = [1, 1]} : vector<8x384xbf16> to vector<8x128xbf16>
    %451 = arith.extf %450 : vector<8x128xbf16> to vector<8x128xf32>
    %452 = vector.extract_strided_slice %449 {offsets = [0, 0], sizes = [8, 128], strides = [1, 1]} : vector<8x384xf32> to vector<8x128xf32>
    %453 = arith.addf %451, %452 : vector<8x128xf32>
    %454 = vector.extract_strided_slice %447 {offsets = [0, 128], sizes = [8, 128], strides = [1, 1]} : vector<8x384xbf16> to vector<8x128xbf16>
    %455 = arith.extf %454 : vector<8x128xbf16> to vector<8x128xf32>
    %456 = vector.extract_strided_slice %449 {offsets = [0, 128], sizes = [8, 128], strides = [1, 1]} : vector<8x384xf32> to vector<8x128xf32>
    %457 = arith.addf %455, %456 : vector<8x128xf32>
    %cst_102 = arith.constant 5.000000e-01 : f32
    %458 = vector.broadcast %cst_102 : f32 to vector<8x128xf32>
    %459 = arith.mulf %458, %453 : vector<8x128xf32>
    %460 = math.tanh %459 : vector<8x128xf32>
    %cst_103 = arith.constant 5.000000e-01 : f32
    %461 = vector.broadcast %cst_103 : f32 to vector<8x128xf32>
    %462 = arith.mulf %461, %460 : vector<8x128xf32>
    %cst_104 = arith.constant 5.000000e-01 : f32
    %463 = vector.broadcast %cst_104 : f32 to vector<8x128xf32>
    %464 = arith.addf %462, %463 : vector<8x128xf32>
    %cst_105 = arith.constant 5.000000e-01 : f32
    %465 = vector.broadcast %cst_105 : f32 to vector<8x128xf32>
    %466 = arith.mulf %465, %457 : vector<8x128xf32>
    %467 = math.tanh %466 : vector<8x128xf32>
    %cst_106 = arith.constant 5.000000e-01 : f32
    %468 = vector.broadcast %cst_106 : f32 to vector<8x128xf32>
    %469 = arith.mulf %468, %467 : vector<8x128xf32>
    %cst_107 = arith.constant 5.000000e-01 : f32
    %470 = vector.broadcast %cst_107 : f32 to vector<8x128xf32>
    %471 = arith.addf %469, %470 : vector<8x128xf32>
    %472 = vector.extract_strided_slice %447 {offsets = [0, 256], sizes = [8, 128], strides = [1, 1]} : vector<8x384xbf16> to vector<8x128xbf16>
    %473 = arith.extf %472 : vector<8x128xbf16> to vector<8x128xf32>
    %474 = vector.extract_strided_slice %449 {offsets = [0, 256], sizes = [8, 128], strides = [1, 1]} : vector<8x384xf32> to vector<8x128xf32>
    %475 = vector.broadcast %11 : vector<1x128xf32> to vector<8x128xf32>
    %476 = arith.addf %474, %475 : vector<8x128xf32>
    %477 = arith.mulf %464, %476 : vector<8x128xf32>
    %478 = arith.addf %473, %477 : vector<8x128xf32>
    %479 = math.tanh %478 : vector<8x128xf32>
    %cst_108 = arith.constant 1.000000e+00 : f32
    %480 = vector.broadcast %cst_108 : f32 to vector<8x128xf32>
    %481 = arith.subf %480, %471 : vector<8x128xf32>
    %482 = arith.mulf %481, %479 : vector<8x128xf32>
    %483 = arith.mulf %471, %442 : vector<8x128xf32>
    %484 = arith.addf %482, %483 : vector<8x128xf32>
    %c8_i32 = arith.constant 8 : i32
    %485 = arith.addi %13, %c8_i32 : i32
    %486 = vector.broadcast %485 : i32 to vector<8x1xi32>
    %487 = arith.cmpi slt, %486, %5 : vector<8x1xi32>
    %488 = arith.extui %487 : vector<8x1xi1> to vector<8x1xi32>
    %489 = arith.sitofp %488 : vector<8x1xi32> to vector<8x1xf32>
    %490 = vector.broadcast %489 : vector<8x1xf32> to vector<8x128xf32>
    %491 = arith.mulf %490, %484 : vector<8x128xf32>
    %cst_109 = arith.constant 1.000000e+00 : f32
    %492 = vector.broadcast %cst_109 : f32 to vector<8x1xf32>
    %493 = arith.subf %492, %489 : vector<8x1xf32>
    %494 = vector.broadcast %493 : vector<8x1xf32> to vector<8x128xf32>
    %495 = arith.mulf %494, %442 : vector<8x128xf32>
    %496 = arith.addf %491, %495 : vector<8x128xf32>
    %497 = arith.mulf %489, %9 : vector<8x1xf32>
    %498 = vector.broadcast %497 : vector<8x1xf32> to vector<8x128xf32>
    %499 = arith.mulf %484, %498 : vector<8x128xf32>
    %c9 = arith.constant 9 : index
    %c0_110 = arith.constant 0 : index
    %c0_111 = arith.constant 0 : index
    %500 = vector.load %arg2[%c9, %c0_110, %c0_111] : memref<10x8x384xbf16, #tpu.memory_space<vmem>>, vector<1x8x384xbf16>
    %501 = vector.shape_cast %500 : vector<1x8x384xbf16> to vector<8x384xbf16>
    %502 = arith.truncf %496 : vector<8x128xf32> to vector<8x128xbf16>
    %cst_112 = arith.constant dense<0.000000e+00> : vector<8x384xf32>
    %503 = tpu.matmul %502, %10, %cst_112 {dimension_numbers = #tpu.dot_dimension_numbers<[1], [0], [0], [1], [0, 0, 1, 1], [], []>} : vector<8x128xbf16>, vector<128x384xbf16>, vector<8x384xf32> -> vector<8x384xf32>
    %504 = vector.extract_strided_slice %501 {offsets = [0, 0], sizes = [8, 128], strides = [1, 1]} : vector<8x384xbf16> to vector<8x128xbf16>
    %505 = arith.extf %504 : vector<8x128xbf16> to vector<8x128xf32>
    %506 = vector.extract_strided_slice %503 {offsets = [0, 0], sizes = [8, 128], strides = [1, 1]} : vector<8x384xf32> to vector<8x128xf32>
    %507 = arith.addf %505, %506 : vector<8x128xf32>
    %508 = vector.extract_strided_slice %501 {offsets = [0, 128], sizes = [8, 128], strides = [1, 1]} : vector<8x384xbf16> to vector<8x128xbf16>
    %509 = arith.extf %508 : vector<8x128xbf16> to vector<8x128xf32>
    %510 = vector.extract_strided_slice %503 {offsets = [0, 128], sizes = [8, 128], strides = [1, 1]} : vector<8x384xf32> to vector<8x128xf32>
    %511 = arith.addf %509, %510 : vector<8x128xf32>
    %cst_113 = arith.constant 5.000000e-01 : f32
    %512 = vector.broadcast %cst_113 : f32 to vector<8x128xf32>
    %513 = arith.mulf %512, %507 : vector<8x128xf32>
    %514 = math.tanh %513 : vector<8x128xf32>
    %cst_114 = arith.constant 5.000000e-01 : f32
    %515 = vector.broadcast %cst_114 : f32 to vector<8x128xf32>
    %516 = arith.mulf %515, %514 : vector<8x128xf32>
    %cst_115 = arith.constant 5.000000e-01 : f32
    %517 = vector.broadcast %cst_115 : f32 to vector<8x128xf32>
    %518 = arith.addf %516, %517 : vector<8x128xf32>
    %cst_116 = arith.constant 5.000000e-01 : f32
    %519 = vector.broadcast %cst_116 : f32 to vector<8x128xf32>
    %520 = arith.mulf %519, %511 : vector<8x128xf32>
    %521 = math.tanh %520 : vector<8x128xf32>
    %cst_117 = arith.constant 5.000000e-01 : f32
    %522 = vector.broadcast %cst_117 : f32 to vector<8x128xf32>
    %523 = arith.mulf %522, %521 : vector<8x128xf32>
    %cst_118 = arith.constant 5.000000e-01 : f32
    %524 = vector.broadcast %cst_118 : f32 to vector<8x128xf32>
    %525 = arith.addf %523, %524 : vector<8x128xf32>
    %526 = vector.extract_strided_slice %501 {offsets = [0, 256], sizes = [8, 128], strides = [1, 1]} : vector<8x384xbf16> to vector<8x128xbf16>
    %527 = arith.extf %526 : vector<8x128xbf16> to vector<8x128xf32>
    %528 = vector.extract_strided_slice %503 {offsets = [0, 256], sizes = [8, 128], strides = [1, 1]} : vector<8x384xf32> to vector<8x128xf32>
    %529 = vector.broadcast %11 : vector<1x128xf32> to vector<8x128xf32>
    %530 = arith.addf %528, %529 : vector<8x128xf32>
    %531 = arith.mulf %518, %530 : vector<8x128xf32>
    %532 = arith.addf %527, %531 : vector<8x128xf32>
    %533 = math.tanh %532 : vector<8x128xf32>
    %cst_119 = arith.constant 1.000000e+00 : f32
    %534 = vector.broadcast %cst_119 : f32 to vector<8x128xf32>
    %535 = arith.subf %534, %525 : vector<8x128xf32>
    %536 = arith.mulf %535, %533 : vector<8x128xf32>
    %537 = arith.mulf %525, %496 : vector<8x128xf32>
    %538 = arith.addf %536, %537 : vector<8x128xf32>
    %c9_i32 = arith.constant 9 : i32
    %539 = arith.addi %13, %c9_i32 : i32
    %540 = vector.broadcast %539 : i32 to vector<8x1xi32>
    %541 = arith.cmpi slt, %540, %5 : vector<8x1xi32>
    %542 = arith.extui %541 : vector<8x1xi1> to vector<8x1xi32>
    %543 = arith.sitofp %542 : vector<8x1xi32> to vector<8x1xf32>
    %544 = vector.broadcast %543 : vector<8x1xf32> to vector<8x128xf32>
    %545 = arith.mulf %544, %538 : vector<8x128xf32>
    %cst_120 = arith.constant 1.000000e+00 : f32
    %546 = vector.broadcast %cst_120 : f32 to vector<8x1xf32>
    %547 = arith.subf %546, %543 : vector<8x1xf32>
    %548 = vector.broadcast %547 : vector<8x1xf32> to vector<8x128xf32>
    %549 = arith.mulf %548, %496 : vector<8x128xf32>
    %550 = arith.addf %545, %549 : vector<8x128xf32>
    %551 = arith.mulf %543, %9 : vector<8x1xf32>
    %552 = vector.broadcast %551 : vector<8x1xf32> to vector<8x128xf32>
    %553 = arith.mulf %538, %552 : vector<8x128xf32>
    %554 = tpu.concatenate %67, %121, %175, %229, %283, %337, %391, %445, %499, %553 in 1 : vector<8x128xf32>, vector<8x128xf32>, vector<8x128xf32>, vector<8x128xf32>, vector<8x128xf32>, vector<8x128xf32>, vector<8x128xf32>, vector<8x128xf32>, vector<8x128xf32>, vector<8x128xf32> -> vector<8x1280xf32>
    %c0_121 = arith.constant 0 : index
    %c0_122 = arith.constant 0 : index
    %555 = vector.load %arg7[%c0_121, %c0_122] : memref<8x1280xf32, #tpu.memory_space<vmem>>, vector<8x1280xf32>
    tpu.vector_store %arg7[%c0_121, %c0_122], %554 {strides = array<i32>} : memref<8x1280xf32, #tpu.memory_space<vmem>>, vector<8x1280xf32>,
    %c0_123 = arith.constant 0 : index
    %c0_124 = arith.constant 0 : index
    %556 = vector.load %arg9[%c0_123, %c0_124] : memref<8x128xf32, #tpu.memory_space<vmem>>, vector<8x128xf32>
    tpu.vector_store %arg9[%c0_123, %c0_124], %550 {strides = array<i32>} : memref<8x128xf32, #tpu.memory_space<vmem>>, vector<8x128xf32>,
    %c1_i32_125 = arith.constant 1 : i32
    %557 = arith.cmpi eq, %arg1, %c1_i32_125 : i32
    %558 = arith.extui %557 : i1 to i32
    %c0_i32_126 = arith.constant 0 : i32
    %559 = arith.cmpi ne, %558, %c0_i32_126 : i32
    scf.if %559 {
      %560 = vector.broadcast %9 : vector<8x1xf32> to vector<8x128xf32>
      %561 = arith.mulf %550, %560 : vector<8x128xf32>
      %c0_127 = arith.constant 0 : index
      %c0_128 = arith.constant 0 : index
      %562 = vector.load %arg8[%c0_127, %c0_128] : memref<8x128xf32, #tpu.memory_space<vmem>>, vector<8x128xf32>
      tpu.vector_store %arg8[%c0_127, %c0_128], %561 {strides = array<i32>} : memref<8x128xf32, #tpu.memory_space<vmem>>, vector<8x128xf32>,
    } else {
    }
    return
  }
  func.func @transform_0(%arg0: i32, %arg1: i32) -> (i32, i32, i32) {
    %c0_i32 = arith.constant 0 : i32
    %c0_i32_0 = arith.constant 0 : i32
    return %arg1, %arg0, %c0_i32 : i32, i32, i32
  }
  func.func @transform_1(%arg0: i32, %arg1: i32) -> (i32, i32) {
    %c0_i32 = arith.constant 0 : i32
    %c0_i32_0 = arith.constant 0 : i32
    return %arg0, %c0_i32 : i32, i32
  }
  func.func @transform_2(%arg0: i32, %arg1: i32) -> (i32, i32) {
    %c0_i32 = arith.constant 0 : i32
    %c0_i32_0 = arith.constant 0 : i32
    return %arg0, %c0_i32 : i32, i32
  }
  func.func @transform_3(%arg0: i32, %arg1: i32) -> (i32, i32) {
    %c0_i32 = arith.constant 0 : i32
    %c0_i32_0 = arith.constant 0 : i32
    %c0_i32_1 = arith.constant 0 : i32
    return %c0_i32, %c0_i32_0 : i32, i32
  }
  func.func @transform_4(%arg0: i32, %arg1: i32) -> (i32, i32) {
    %c0_i32 = arith.constant 0 : i32
    %c0_i32_0 = arith.constant 0 : i32
    %c0_i32_1 = arith.constant 0 : i32
    return %c0_i32, %c0_i32_0 : i32, i32
  }
  func.func @transform_5(%arg0: i32, %arg1: i32) -> (i32, i32) {
    %c0_i32 = arith.constant 0 : i32
    return %arg0, %arg1 : i32, i32
  }
  func.func @transform_6(%arg0: i32, %arg1: i32) -> (i32, i32) {
    %c0_i32 = arith.constant 0 : i32
    %c0_i32_0 = arith.constant 0 : i32
    return %arg0, %c0_i32 : i32, i32
  }
}

</mosaic_0001>

<bundles_post_ra>
// kernel: tpu_custom_call.1
= control target key start
LH: loop header
LB: loop body
LE: loop exit
PB: predicated region body
PF: predicated region fallthrough
CT: control target
= control target key end

     0   :  { %s3736_s0 = inlined_call_operand.hbm [shape: bf16[20,8,384], index: 0, kind: input, shape index: {}]   ;;  %s3737_s1 = inlined_call_operand.vmem [shape: f32[8,128], index: 1, kind: input, shape index: {}]   ;;  %s3738_s2 = inlined_call_operand.vmem [shape: s32[8,1], index: 2, kind: input, shape index: {}]   ;;  %s3739_s3 = inlined_call_operand.hbm [shape: bf16[128,384], index: 3, kind: input, shape index: {}]   ;;  %s3740_s4 = inlined_call_operand.vmem [shape: f32[1,128], index: 4, kind: input, shape index: {}]   ;;  %s3741_s5 = inlined_call_operand.hbm [shape: f32[8,2560], index: 5, kind: output, shape index: {0}]   ;;  %s3742_s6 = inlined_call_operand.hbm [shape: f32[8,128], index: 6, kind: output, shape index: {1}]  }
   0x1   :  { %3749 = sst [smem:[#allocation16_spill]] %s3739_s3 }
   0x2   :  { %12 = vsyncpa [#allocation4], 0 }
   0x3   :  { %14 = vsyncpa [#allocation4 + $0x1], 0 }
   0x4   :  { %15 = vsyncpa [#allocation7], 0 }
   0x5   :  { %16 = vsyncpa [#allocation5], 0 }
   0x6   :  { %18 = vsyncpa [#allocation5 + $0x1], 0 }
   0x7   :  { %19 = vsyncpa [#allocation10], 0  ;;  %s2849_s21 = smov 0   ;;  %s2851_s22 = smov 0  }
   0x8   :  { %s2853_s23 = smov 0   ;;  %s2855_s24 = smov 0  }
   0x9   :  { %s2857_s25 = smov 0   ;;  %s2859_s26 = smov 0  }
   0xa LB: > { %s2063_s27 = sadd.s32 4294967295, %s2802_s26   ;;  %s2064_s28 = sadd.s32 4294967294, %s2802_s26   ;;  %s2802_s26 = sphi %s2859_s26, %s25_s26   ;;  %s2798_s25 = sphi %s2857_s25, %s3771_s25   ;;  %s2794_s24 = sphi %s2855_s24, %s3770_s24   ;;  %s2790_s23 = sphi %s2853_s23, %s3769_s23   ;;  %s2786_s22 = sphi %s2851_s22, %s3768_s22   ;;  %s2782_s21 = sphi %s2849_s21, %s3767_s21  }
   0xb   : > { %p59_p0 = scmp.ne.s32.totalorder %s2786_s22, %s2782_s21  ;;  %p2883_p1 = scmp.eq.s32.totalorder %s2063_s27, 0 }
   0xc   : > { %p2887_p2 = scmp.eq.s32.totalorder %s2063_s27, 1  ;;  %p185_p3 = scmp.eq.s32.totalorder %s2064_s28, 1 }
   0xd   : > { %p2893_p4 = por %p2883_p1, %p59_p0  ;;  %p2065_p5 = scmp.ge.s32.totalorder %s2802_s26, 1 }
   0xe   : > { %p2898_p6 = por %p185_p3, %p59_p0  ;;  %p218_p7 = scmp.lt.s32.totalorder %s2802_s26, 3 }
   0xf   : > { %s3752_s7 = scalar_select %p2893_p4, 1, 0 }
  0x10   : > { %s3753_s8 = scalar_select %p2898_p6, 1, 0 }
  0x11   : > { %p2903_p8 = pnand %p2065_p5, %p218_p7  ;;  %s2804_s10 = smov [#allocation6]  }
  0x12   : > { %s244_s11 = sshll.u32 %s2804_s10, 4  ;;  %s34_s13 = sadd.s32 1, %s2798_s25  ;;  %s245_s11 = int_to_ptr.vmem [resolvable:$true] %s244_s11 }
  0x13   : > { %p2441_p9 = pneg %p2903_p8  ;;  %s2647_s14 = scalar_lea.vmem %s245_s11, 3072 }
  0x14   : > { %p2648_p13 = scmp.ne.s32.totalorder %s245_s11, %s2647_s14  ;;  %p2655_p5 = scmp.lt.s32.totalorder %s245_s11, %s245_s11 }
  0x15   : > { %p2912_p11 = pnand %p2441_p9, %p2883_p1  ;;  %p2656_p7 = scmp.lt.s32.totalorder %s2647_s14, %s2647_s14 }
  0x17   : > { %p2638_p12 = pneg %p2912_p11  ;;  %p2657_p6 = por %p2656_p7, %p2655_p5 }
  0x19   : > { %p2650_p0 = pnand %p2648_p13, %p2638_p12 }
  0x1b   : > { %p2651_p3 = pneg %p2650_p0 }
  0x1d   : > { %p2658_p4 = pnand %p2657_p6, %p2651_p3 }
  0x1f   : > { %2661 = shalt.err (!%p2658_p4)
}
  0x20   : > { %s3744_s15 = smov 192   ;;  %s3745_s16 = smov 12  }
  0x21   : > { %s3756_s3 = sld [smem:[#allocation16_spill]]  ;;  %p35_p4 = scmp.ge.s32.totalorder %s34_s13, 2 }
  0x22   : > { %s46_s19 = sadd.s32 1, %s2790_s23  ;;  %p53_p6 = scmp.ne.s32.totalorder %s2790_s23, %s2786_s22 }
  0x23   : > { %p54_p9 = scmp.eq.s32.totalorder %s2802_s26, 0  ;;  %s3773_s13 = smov (%p35_p4, %s34_s13), 0 }
  0x24   : > { %3757 = sst [smem:[#allocation15_spill]] %s3773_s13  ;;  %p2935_p13 = por %p2887_p2, %p53_p6 }
  0x25   : > { %p55_p12 = por %p54_p9, %p53_p6  ;;  %s41_s27 = ssub.s32 %s2798_s25, %s3773_s13 }
  0x26   : > { %p2454_p0 = scmp.lt.s32.totalorder %s2802_s26, 2  ;;  %p44_p3 = scmp.eq.s32.totalorder %s41_s27, 0 }
  0x27   : > { %2444 = dma.hbm_to_vmem [thread:$0]  (!%p2912_p11), %s3756_s3, 3072, %s245_s11, [#allocation7], %s3744_s15, %s3744_s15, %s3745_s16  }
  0x28   : > { %s261_s28 = sand.u32 1, %s2790_s23   ;;  %s2455_s11 = smul.u32 1920, %s2798_s25 }
  0x29   : > { %s2425_s10 = smul.u32 120, %s261_s28  ;;  %p2947_p11 = pnand %p2454_p0, %p55_p12 }
  0x2a   : > { %s2944_s12 = scalar_select %p44_p3, %s2790_s23, %s46_s19  }
  0x2b   : > { %s265_s14 = scalar_lea.vmem [#allocation3], %s2425_s10  ;;  %s274_s3 = scalar_lea.hbm %s3736_s0, %s2455_s11 }
  0x2c   : > { %s275_s17 = sshll.u32 %s265_s14, 4  ;;  %s262_s13 = scalar_lea.sflag [#allocation4], %s261_s28  ;;  %s276_s17 = int_to_ptr.vmem [resolvable:$true] %s275_s17 }
  0x2d   : > { %p2664_p5 = pneg %p2947_p11  ;;  %s2675_s27 = scalar_lea.vmem %s276_s17, 1920 }
  0x2e   : > { %p2676_p7 = scmp.ne.s32.totalorder %s276_s17, %s2675_s27  ;;  %s2807_s19 = smov [#allocation3]  }
  0x2f   : > { %s2680_s10 = sshll.u32 %s2807_s19, 4  ;;  %s2681_s10 = int_to_ptr.vmem [resolvable:$false] %s2680_s10 }
  0x30   : > { %p2678_p4 = pnand %p2676_p7, %p2664_p5  ;;  %s2682_s14 = scalar_lea.vmem %s2681_s10, 3840 }
  0x31   : > { %p2683_p9 = scmp.lt.s32.totalorder %s276_s17, %s2681_s10  ;;  %p2684_p12 = scmp.lt.s32.totalorder %s2682_s14, %s2675_s27 }
  0x32   : > { %p2679_p6 = pneg %p2678_p4 }
  0x33   : > { %p2685_p0 = por %p2684_p12, %p2683_p9 }
  0x35   : > { %p2686_p3 = pnand %p2685_p0, %p2679_p6 }
  0x37   : > { %2689 = shalt.err (!%p2686_p3)
}
  0x38   : > { %s3760_s15 = smov 12   ;;  %s3761_s16 = smov 192  }
  0x39   : > { %2448 = dma.hbm_to_vmem [thread:$0]  (!%p2947_p11), %s274_s3, 1920, %s276_s17, %s262_s13, %s3761_s16, %s3761_s16, %s3760_s15  }
  0x3a   : > { %287 = sbr.rel (%p2903_p8) target bundleno = 2706 (0xa92), region = 40  ;;  %s2964_s28 = sand.u32 (!%p2903_p8), 1, %s2786_s22  }
  0x3b   : > { %s2427_s11 = smul.u32 (!%p2903_p8), 120, %s2964_s28  ;;  %s290_s27 = scalar_lea.sflag (!%p2903_p8), [#allocation4], %s2964_s28 }
  0x3c   : > { %p3762_p5 = scmp.ne.s32.totalorder (!%p2903_p8), %s3752_s7, 0 }
  0x3d   : > { %s2968_s19 = scalar_lea.vmem (!%p2903_p8), [#allocation3], %s2427_s11 }
  0x3f   : > { %2765 = dma.done.wait (%p3762_p5), %s290_s27, 1920  }
  0x40   : > { %2767 = vsyncadd (%p3762_p5), %s290_s27, 4294965376 }
  0x41   : > { %2769 = dma.done.wait (%p2883_p1), [#allocation7], 3072  }
  0x42   : > { %2771 = vsyncadd (%p2883_p1), [#allocation7], 4294964224  ;;  %s2428_s3 = smul.u32 80, %s2964_s28  ;;  %p2073_p8 = scmp.ne.s32.totalorder %s2794_s24, 0 }
  0x44   : > { %s2979_s9 = scalar_lea.vmem [#allocation8], %s2428_s3  ;;  %348 = sbr.rel (%p2073_p8) target bundleno = 75 (0x4b), region = 52 }
  0x49   : > { %v349_v0 = vld [vmem:[%s3737_s1] sm:$0xff] }
  0x4a   : > { %350 = vst [vmem:[#allocation2] sm:$0xff] %v349_v0 }
  0x4b PF: > { %v2985_v1 = vld [vmem:[#allocation6 + $0xac] ss:$12 sps:$4 sm:$0xff]   ;;  %v2987_v2 = vld [vmem:[#allocation6 + $0xa8] ss:$12 sps:$4 sm:$0xff]   ;;  %v2808_v3 = vmov 0.0   ;;  %v3747_v4 = vmov 0  }
  0x4c   : > { %2225 = vmatprep.subr.bf16.mxu1 %v2808_v3  ;;  %555 = vmatprep.mubr.bf16.mxu0 %v3747_v4  ;;  %v2992_v5 = vld [vmem:[#allocation6 + $0x94] ss:$12 sps:$4 sm:$0xff]   ;;  %vm2810_vm0 = vmmov 0   ;;  %v2997_v6 = vld [vmem:[#allocation6 + $0x90] ss:$12 sps:$4 sm:$0xff]   ;;  %s3027_s29 = smul.u32 10, %s2794_s24 }
  0x4d   : > { %523 = vmatprep.subr.bf16.mxu0 %v2985_v1  ;;  %2241 = vmatprep.mubr.msk.bf16.mxu1 %vm2810_vm0, %v2808_v3  ;;  %v3001_v7 = vld [vmem:[#allocation6 + $0x7c] ss:$12 sps:$4 sm:$0xff]   ;;  %v3007_v9 = vld [vmem:[#allocation6 + $0x78] ss:$12 sps:$4 sm:$0xff]   ;;  %v3016_v12 = vld [vmem:[#allocation6 + $0x60] ss:$12 sps:$4 sm:$0xff]  }
  0x4e   : > { %524 = vmatpush1.bf16.msra.mxu0 %v2987_v2  ;;  %2516 = vset.pattern.permute.xlu0 %v3747_v4  ;;  %v3004_v8 = vld [vmem:[#allocation6 + $0xb0] ss:$12 sps:$4 sm:$0xff]   ;;  %v3013_v11 = vld [vmem:[#allocation6 + $0x98] ss:$12 sps:$4 sm:$0xff]   ;;  %v3023_v14 = vld [vmem:[#allocation6 + $0x80] ss:$12 sps:$4 sm:$0xff]   ;;  %v634_v20 = vstv %s3027_s29 }
  0x4f   : > { %525 = vmatprep.subr.bf16.mxu0 %v2992_v5  ;;  %2517 = vset.pattern.permute.xlu1 %v3747_v4  ;;  %v3009_v10 = vld [vmem:[#allocation6 + $0x64] ss:$12 sps:$4 sm:$0xff]   ;;  %v3019_v13 = vld [vmem:[#allocation6 + $0x4c] ss:$12 sps:$4 sm:$0xff]   ;;  %v3030_v15 = vld [vmem:[#allocation6 + $0x48] ss:$12 sps:$4 sm:$0xff]  }
  0x50   : > { %2226 = vmatpush3.bf16.msra.mxu1 %v3004_v8  ;;  %v3032_v16 = vld [vmem:[#allocation6 + $0x34] ss:$12 sps:$4 sm:$0xff]   ;;  %v3040_v18 = vld [vmem:[#allocation6 + $0x30] ss:$12 sps:$4 sm:$0xff]   ;;  %v3045_v19 = vld [vmem:[%s3738_s2] sm:$0xff]  ;;  %s903_s10 = sadd.s32 2, %s3027_s29 }
  0x51   : > { %2227 = vmatprep.subr.bf16.mxu1 %v2808_v3  ;;  %v3036_v17 = vld [vmem:[#allocation6 + $0x68] ss:$12 sps:$4 sm:$0xff]   ;;  %v3052_v22 = vld [vmem:[#allocation6 + $0x50] ss:$12 sps:$4 sm:$0xff]   ;;  %vm352_vm1 = vcmp.gt.s32.totalorder %v3045_v19, 1  ;;  %s768_s14 = sadd.s32 1, %s3027_s29  ;;  %v904_v28 = vstv %s903_s10 }
  0x52   : > { %526 = vmatpush1.bf16.msra.mxu0 %v2997_v6  ;;  %v3049_v21 = vld [vmem:[#allocation6 + $0x1c] ss:$12 sps:$4 sm:$0xff]   ;;  %v3057_v23 = vsel %vm352_vm1, %v3045_v19, 1  ;;  %v3063_v24 = vld [vmem:[#allocation6 + $0x18] ss:$12 sps:$4 sm:$0xff]   ;;  %s1038_s15 = sadd.s32 3, %s3027_s29  ;;  %v769_v30 = vstv %s768_s14 }
  0x53   : > { %527 = vmatprep.subr.bf16.mxu0 %v3001_v7  ;;  %vm635_vm2 = vcmp.lt.s32.totalorder %v634_v20, %v3057_v23  ;;  %v3069_v26 = vld [vmem:[#allocation6 + $0x4] ss:$12 sps:$4 sm:$0xff]   ;;  %v3079_v31 = vld [vmem:[#allocation6] ss:$12 sps:$4 sm:$0xff]   ;;  %vm905_vm3 = vcmp.lt.s32.totalorder %v904_v28, %v3057_v23  ;;  %v1039_v34 = vstv %s1038_s15  ;;  %vm770_vm4 = vcmp.lt.s32.totalorder %v769_v30, %v3057_v23  ;;  %s1173_s16 = sadd.s32 4, %s3027_s29  ;;  %s1308_s11 = sadd.s32 5, %s3027_s29 }
  0x54   : > { %2228 = vmatpush3.bf16.msra.mxu1 %v3013_v11  ;;  %v3066_v25 = vsel %vm635_vm2, 1.0, %v2808_v3  ;;  %v3072_v27 = vld [vmem:[#allocation6 + $0x38] ss:$12 sps:$4 sm:$0xff]   ;;  %v3081_v32 = vld [vmem:[#allocation2] sm:$0xff]  ;;  %v3092_v35 = vsel %vm770_vm4, 1.0, %v2808_v3  ;;  %v3097_v37 = vsel %vm905_vm3, 1.0, %v2808_v3  ;;  %vm1040_vm5 = vcmp.lt.s32.totalorder %v1039_v34, %v3057_v23 }
  0x55   : > { %2229 = vmatprep.subr.bf16.mxu1 %v2808_v3  ;;  %640 = vperm.xlu0 %2516, %v3066_v25   ;;  %v644_v29 = vsub.f32 1.0, %v3066_v25  ;;  %v3086_v33 = vld [vmem:[#allocation6 + $0x20] ss:$12 sps:$4 sm:$0xff]   ;;  %v394_v36 = vpack.c.bf16 %v3081_v32, %v3081_v32  ;;  %v779_v38 = vsub.f32 1.0, %v3092_v35  ;;  %v3104_v39 = vld [vmem:[#allocation6 + $0x8] ss:$12 sps:$4 sm:$0xff]   ;;  %v1174_v40 = vstv %s1173_s16 }
  0x56   : > { %528 = vmatpush1.bf16.msra.mxu0 %v3007_v9  ;;  %775 = vperm.xlu1 %2517, %v3092_v35   ;;  %v3111_v41 = vsel %vm1040_vm5, 1.0, %v2808_v3  ;;  %vm1175_vm6 = vcmp.lt.s32.totalorder %v1174_v40, %v3057_v23  ;;  %v1309_v42 = vstv %s1308_s11  ;;  %s1443_s27 = sadd.s32 6, %s3027_s29  ;;  %s1578_s3 = sadd.s32 7, %s3027_s29  ;;  %vm354_vm12 = vcmp.ne.s32.totalorder %v3045_v19, 0 }
  0x57   : > { %529 = vmatprep.subr.bf16.mxu0 %v3009_v10  ;;  %v3122_v43 = vsel %vm1175_vm6, 1.0, %v2808_v3  ;;  %vm1310_vm7 = vcmp.lt.s32.totalorder %v1309_v42, %v3057_v23  ;;  %v1444_v44 = vstv %s1443_s27  ;;  %v1579_v46 = vstv %s1578_s3  ;;  %s1713_s13 = sadd.s32 8, %s3027_s29  ;;  %s1848_s17 = sadd.s32 9, %s3027_s29 }
  0x58   : > { %2230 = vmatpush3.bf16.msra.mxu1 %v3023_v14  ;;  %v3132_v45 = vsel %vm1310_vm7, 1.0, %v2808_v3  ;;  %vm1445_vm8 = vcmp.lt.s32.totalorder %v1444_v44, %v3057_v23  ;;  %vm1580_vm9 = vcmp.lt.s32.totalorder %v1579_v46, %v3057_v23  ;;  %v1714_v48 = vstv %s1713_s13  ;;  %p2128_p1 = scmp.ne.s32.totalorder %s2794_s24, 1 }
  0x59   : > { %2231 = vmatprep.subr.bf16.mxu1 %v2808_v3  ;;  %647 = vperm.xlu0 %2516, %v644_v29   ;;  %v2118_v47 = vsel %vm1445_vm8, 1.0, %v2808_v3  ;;  %v2121_v49 = vsel %vm1580_vm9, 1.0, %v2808_v3  ;;  %vm1715_vm10 = vcmp.lt.s32.totalorder %v1714_v48, %v3057_v23  ;;  %v1849_v50 = vstv %s1848_s17 }
  0x5a   : > { %530 = vmatpush1.bf16.msra.mxu0 %v3016_v12  ;;  %782 = vperm.xlu1 %2517, %v779_v38   ;;  %v2124_v51 = vsel %vm1715_vm10, 1.0, %v2808_v3  ;;  %vm1850_vm11 = vcmp.lt.s32.totalorder %v1849_v50, %v3057_v23  ;;  %v3165_v53 = vsel %vm354_vm12, 1.0, %v2808_v3  ;;  %v914_v59 = vsub.f32 1.0, %v3097_v37 }
  0x5b   : > { %531 = vmatprep.subr.bf16.mxu0 %v3019_v13  ;;  %v2127_v52 = vsel %vm1850_vm11, 1.0, %v2808_v3  ;;  %v652_v54 = vmul.f32 %v3066_v25, %v3165_v53  ;;  %v922_v55 = vmul.f32 %v3097_v37, %v3165_v53  ;;  %v1192_v56 = vmul.f32 %v3122_v43, %v3165_v53 }
  0x5c   : > { %2232 = vmatpush3.bf16.msra.mxu1 %v3036_v17  ;;  %v1462_v57 = vmul.f32 %v2118_v47, %v3165_v53  ;;  %v1732_v58 = vmul.f32 %v2124_v51, %v3165_v53  ;;  %v1049_v60 = vsub.f32 1.0, %v3111_v41  ;;  %v1184_v61 = vsub.f32 1.0, %v3122_v43 }
  0x5d   : > { %2233 = vmatprep.subr.bf16.mxu1 %v2808_v3  ;;  %910 = vperm.xlu0 %2516, %v3097_v37   ;;  %v1319_v62 = vsub.f32 1.0, %v3132_v45  ;;  %v1454_v63 = vsub.f32 1.0, %v2118_v47  ;;  %v1589_v0 = vsub.f32 1.0, %v2121_v49  ;;  %v1724_v19 = vsub.f32 1.0, %v2124_v51  ;;  %v392_v37 = vld [vmem:[%s2968_s19] sm:$0xff] }
  0x5e   : > { %532 = vmatpush1.bf16.msra.mxu0 %v3030_v15  ;;  %917 = vperm.xlu1 %2517, %v914_v59   ;;  %v1859_v20 = vsub.f32 1.0, %v2127_v52  ;;  %v787_v23 = vmul.f32 %v3092_v35, %v3165_v53  ;;  %v1057_v25 = vmul.f32 %v3111_v41, %v3165_v53  ;;  %v1327_v28 = vmul.f32 %v3132_v45, %v3165_v53 }
  0x5f   : > { %533 = vmatprep.subr.bf16.mxu0 %v3032_v16  ;;  %v1597_v29 = vmul.f32 %v2121_v49, %v3165_v53  ;;  %v1867_v30 = vmul.f32 %v2127_v52, %v3165_v53  ;;  %v604_v35 = vunpack.c.l.bf16 %v392_v37  ;;  %v607_v40 = vrot.slane %v392_v37, 4 }
  0x60   : > { %2234 = vmatpush3.bf16.msra.mxu1 %v3052_v22 }
  0x61   : > { %2235 = vmatprep.subr.bf16.mxu1 %v2808_v3  ;;  %1045 = vperm.xlu0 %2516, %v3111_v41   ;;  %v609_v46 = vunpack.c.l.bf16 %v607_v40 }
  0x62   : > { %534 = vmatpush1.bf16.msra.mxu0 %v3040_v18  ;;  %1052 = vperm.xlu1 %2517, %v1049_v60   ;;  %v3212_v60 = vld [vmem:[%s2968_s19 + $0x8] ss:$12 sps:$4 sm:$0xff]  }
  0x63   : > { %535 = vmatprep.subr.bf16.mxu0 %v3049_v21 }
  0x64   : > { %2236 = vmatpush3.bf16.msra.mxu1 %v3072_v27 }
  0x65   : > { %2237 = vmatprep.subr.bf16.mxu1 %v2808_v3  ;;  %1180 = vperm.xlu0 %2516, %v3122_v43  }
  0x66   : > { %536 = vmatpush1.bf16.msra.mxu0 %v3063_v24  ;;  %1187 = vperm.xlu1 %2517, %v1184_v61  }
  0x67   : > { %537 = vmatprep.subr.bf16.mxu0 %v3069_v26 }
  0x68   : > { %2238 = vmatpush3.bf16.msra.mxu1 %v3086_v33 }
  0x69   : > { %2239 = vmatprep.subr.bf16.mxu1 %v2808_v3  ;;  %1315 = vperm.xlu0 %2516, %v3132_v45  }
  0x6a   : > { %538 = vmatpush1.bf16.msra.mxu0 %v3079_v31  ;;  %1322 = vperm.xlu1 %2517, %v1319_v62  }
  0x6b   : > { %663 = vmatprep.subr.bf16.mxu0 %v2985_v1 }
  0x6c   : > { %2240 = vmatpush3.bf16.msra.mxu1 %v3104_v39 }
  0x6d   : > { %556 = vmatmul.mubr.bf16.vlgmr.msra.gmra.mxu0 %v394_v36  ;;  %2245 = vmatprep.subr.bf16.mxu1 %v2808_v3 }
  0x6e   : > { %664 = vmatpush1.bf16.msra.mxu0 %v2987_v2  ;;  %695 = vmatprep.mubr.bf16.mxu0 %v3747_v4 }
  0x6f   : > { %665 = vmatprep.subr.bf16.mxu0 %v2992_v5  ;;  %2242 = vmatmul.mubr.bf16.vlgmr.msra.gmra.mxu1 %v394_v36 }
  0x70   : > { %2246 = vmatpush3.bf16.msra.mxu1 %v3004_v8  ;;  %2261 = vmatprep.mubr.msk.bf16.mxu1 %vm2810_vm0, %v2808_v3 }
  0x71   : > { %2247 = vmatprep.subr.bf16.mxu1 %v2808_v3  ;;  %1450 = vperm.xlu0 %2516, %v2118_v47  }
  0x72   : > { %666 = vmatpush1.bf16.msra.mxu0 %v2997_v6  ;;  %1457 = vperm.xlu1 %2517, %v1454_v63  }
  0x73   : > { %667 = vmatprep.subr.bf16.mxu0 %v3001_v7 }
  0x74   : > { %2248 = vmatpush3.bf16.msra.mxu1 %v3013_v11 }
  0x75   : > { %2249 = vmatprep.subr.bf16.mxu1 %v2808_v3  ;;  %1585 = vperm.xlu0 %2516, %v2121_v49  }
  0x76   : > { %668 = vmatpush1.bf16.msra.mxu0 %v3007_v9  ;;  %1592 = vperm.xlu1 %2517, %v1589_v0  }
  0x77   : > { %669 = vmatprep.subr.bf16.mxu0 %v3009_v10 }
  0x78   : > { %2250 = vmatpush3.bf16.msra.mxu1 %v3023_v14 }
  0x79   : > { %2251 = vmatprep.subr.bf16.mxu1 %v2808_v3  ;;  %1720 = vperm.xlu0 %2516, %v2124_v51  }
  0x7a   : > { %670 = vmatpush1.bf16.msra.mxu0 %v3016_v12  ;;  %1727 = vperm.xlu1 %2517, %v1724_v19   ;;  %v619_v19 = vunpack.c.l.bf16 %v3212_v60 }
  0x7b   : > { %671 = vmatprep.subr.bf16.mxu0 %v3019_v13 }
  0x7c   : > { %2252 = vmatpush3.bf16.msra.mxu1 %v3036_v17 }
  0x7d   : > { %2253 = vmatprep.subr.bf16.mxu1 %v2808_v3  ;;  %1855 = vperm.xlu0 %2516, %v2127_v52  }
  0x7e   : > { %672 = vmatpush1.bf16.msra.mxu0 %v3030_v15  ;;  %1862 = vperm.xlu1 %2517, %v1859_v20  }
  0x7f   : > { %673 = vmatprep.subr.bf16.mxu0 %v3032_v16 }
  0x80   : > { %2254 = vmatpush3.bf16.msra.mxu1 %v3052_v22 }
  0x81   : > { %2255 = vmatprep.subr.bf16.mxu1 %v2808_v3  ;;  %655 = vperm.xlu0 %2516, %v652_v54  }
  0x82   : > { %674 = vmatpush1.bf16.msra.mxu0 %v3040_v18  ;;  %790 = vperm.xlu1 %2517, %v787_v23  }
  0x83   : > { %675 = vmatprep.subr.bf16.mxu0 %v3049_v21 }
  0x84   : > { %2256 = vmatpush3.bf16.msra.mxu1 %v3072_v27 }
  0x85   : > { %2257 = vmatprep.subr.bf16.mxu1 %v2808_v3  ;;  %925 = vperm.xlu0 %2516, %v922_v55  }
  0x86   : > { %676 = vmatpush1.bf16.msra.mxu0 %v3063_v24  ;;  %1060 = vperm.xlu1 %2517, %v1057_v25  }
  0x87   : > { %677 = vmatprep.subr.bf16.mxu0 %v3069_v26 }
  0x88   : > { %2258 = vmatpush3.bf16.msra.mxu1 %v3086_v33 }
  0x89   : > { %2259 = vmatprep.subr.bf16.mxu1 %v2808_v3  ;;  %1195 = vperm.xlu0 %2516, %v1192_v56  }
  0x8a   : > { %678 = vmatpush1.bf16.msra.mxu0 %v3079_v31  ;;  %1330 = vperm.xlu1 %2517, %v1327_v28  }
  0x8b   : > { %798 = vmatprep.subr.bf16.mxu0 %v2985_v1 }
  0x8c   : > { %2260 = vmatpush3.bf16.msra.mxu1 %v3104_v39 }
  0x8d   : > { %2265 = vmatprep.subr.bf16.mxu1 %v2808_v3  ;;  %1465 = vperm.xlu0 %2516, %v1462_v57  }
  0x8e   : > { %1600 = vperm.xlu1 %2517, %v1597_v29  }
  0x91   : > { %1735 = vperm.xlu0 %2516, %v1732_v58   ;;  %v3209_v58 = vld [vmem:[%s3740_s4] ss:$0 sm:$0xff] }
  0x92   : > { %1870 = vperm.xlu1 %2517, %v1867_v30  }
  0xd0   : > { %v641_v34 = vpop.permute.xlu0 %640 }
  0xd4   : > { %v648_v36 = vpop.permute.xlu0 %647 }
  0xd8   : > { %v3198_v38 = vpop.permute.xlu0 %910 }
  0xdc   : > { %v3200_v43 = vpop.permute.xlu0 %1045 }
  0xe0   : > { %v3202_v52 = vpop.permute.xlu0 %1180 }
  0xe4   : > { %v3204_v57 = vpop.permute.xlu0 %1315 }
  0xec   : > { %v3215_v63 = vpop.permute.xlu0 %1450 }
  0xf0   : > { %v3218_v25 = vpop.permute.xlu0 %1585 }
  0xf4   : > { %v3220_v30 = vpop.permute.xlu0 %1720 }
 0x12d   : > { %v557_v42 = vpop.f32.mrf.mxu0 }
 0x12e   : > { %v605_v41 = vadd.f32 %v604_v35, %v557_v42  ;;  %v3222_v35 = vpop.permute.xlu0 %1855 }
 0x12f   : > { %v559_v44 = vpop.f32.mrf.mxu0  ;;  %v598_v48 = vpop.f32.mrf.mxu1 }
 0x130   : > { %v611_v45 = vmul.f32 0.5, %v605_v41  ;;  %v610_v50 = vadd.f32 %v609_v46, %v559_v44  ;;  %v626_v62 = vadd.f32 %v3209_v58, %v598_v48 }
 0x131   : > { %v561_v47 = vpop.f32.mrf.mxu0  ;;  %v2243_v51 = vpop.f32.mrf.mxu1 }
 0x132   : > { %2550 = vtanh.f32 %v611_v45  ;;  %v615_v55 = vmul.f32 0.5, %v610_v50  ;;  %v656_v46 = vpop.permute.xlu0 %655  ;;  %v650_v47 = vmul.f32 %v648_v36, %v3081_v32  ;;  %v2101_v36 = vld [vmem:[%s2968_s19 + $0xc] sm:$0xff] }
 0x133   : > { %v562_v49 = vpop.f32.mrf.mxu0  ;;  %v601_v54 = vpop.f32.mrf.mxu1 }
 0x134   : > { %2552 = vtanh.f32 %v615_v55  ;;  %v744_v55 = vunpack.c.l.bf16 %v2101_v36 }
 0x135   : > { %v2244_v56 = vpop.f32.mrf.mxu1 }
 0x136   : > { %v747_v56 = vrot.slane %v2101_v36, 4  ;;  %v759_v36 = vunpack.c.h.bf16 %v3212_v60 }
 0x13f   : > { %v2551_v59 = vpop.eup %2550 }
 0x140   : > { %v613_v61 = vmul.f32 0.5, %v2551_v59 }
 0x141   : > { %v2553_v28 = vpop.eup %2552 }
 0x142   : > { %v614_v0 = vadd.f32 0.5, %v613_v61  ;;  %v617_v29 = vmul.f32 0.5, %v2553_v28  ;;  %v749_v28 = vunpack.c.l.bf16 %v747_v56 }
 0x144   : > { %v627_v20 = vmul.f32 %v626_v62, %v614_v0  ;;  %v618_v37 = vadd.f32 0.5, %v617_v29 }
 0x146   : > { %v628_v23 = vadd.f32 %v627_v20, %v619_v19  ;;  %v630_v40 = vsub.f32 1.0, %v618_v37  ;;  %v632_v44 = vmul.f32 %v618_v37, %v3081_v32  ;;  %v776_v32 = vpop.permute.xlu1 %775 }
 0x148   : > { %2554 = vtanh.f32 %v628_v23 }
 0x155   : > { %v2555_v42 = vpop.eup %2554 }
 0x156   : > { %v631_v41 = vmul.f32 %v2555_v42, %v630_v40 }
 0x158   : > { %v633_v45 = vadd.f32 %v632_v44, %v631_v41 }
 0x15a   : > { %v643_v48 = vmul.f32 %v641_v34, %v633_v45  ;;  %v658_v49 = vmul.f32 %v656_v46, %v633_v45  ;;  %v783_v34 = vpop.permute.xlu1 %782 }
 0x15c   : > { %1874 = vst [vmem:[%s2979_s9] sm:$0xff] %v658_v49  ;;  %v3227_v50 = vadd.f32 %v650_v47, %v643_v48 }
 0x15e   : > { %v662_v51 = vpack.c.bf16 %v3227_v50, %v3227_v50  ;;  %v3267_v54 = vpop.permute.xlu1 %917 }
 0x160   : > { %696 = vmatmul.mubr.bf16.vlgmr.msra.gmra.mxu0 %v662_v51  ;;  %2262 = vmatmul.mubr.bf16.vlgmr.msra.gmra.mxu1 %v662_v51 }
 0x161   : > { %799 = vmatpush1.bf16.msra.mxu0 %v2987_v2  ;;  %2266 = vmatpush3.bf16.msra.mxu1 %v3004_v8 }
 0x162   : > { %800 = vmatprep.subr.bf16.mxu0 %v2992_v5  ;;  %2267 = vmatprep.subr.bf16.mxu1 %v2808_v3  ;;  %v3269_v62 = vpop.permute.xlu1 %1052 }
 0x163   : > { %830 = vmatprep.mubr.bf16.mxu0 %v3747_v4  ;;  %2281 = vmatprep.mubr.msk.bf16.mxu1 %vm2810_vm0, %v2808_v3 }
 0x165   : > { %801 = vmatpush1.bf16.msra.mxu0 %v2997_v6  ;;  %2268 = vmatpush3.bf16.msra.mxu1 %v3013_v11 }
 0x166   : > { %802 = vmatprep.subr.bf16.mxu0 %v3001_v7  ;;  %2269 = vmatprep.subr.bf16.mxu1 %v2808_v3  ;;  %v3271_v44 = vpop.permute.xlu1 %1187 }
 0x169   : > { %803 = vmatpush1.bf16.msra.mxu0 %v3007_v9  ;;  %2270 = vmatpush3.bf16.msra.mxu1 %v3023_v14 }
 0x16a   : > { %804 = vmatprep.subr.bf16.mxu0 %v3009_v10  ;;  %2271 = vmatprep.subr.bf16.mxu1 %v2808_v3  ;;  %v3273_v46 = vpop.permute.xlu1 %1322 }
 0x16d   : > { %805 = vmatpush1.bf16.msra.mxu0 %v3016_v12  ;;  %2272 = vmatpush3.bf16.msra.mxu1 %v3036_v17 }
 0x16e   : > { %806 = vmatprep.subr.bf16.mxu0 %v3019_v13  ;;  %2273 = vmatprep.subr.bf16.mxu1 %v2808_v3  ;;  %v3275_v49 = vpop.permute.xlu1 %1457 }
 0x171   : > { %807 = vmatpush1.bf16.msra.mxu0 %v3030_v15  ;;  %2274 = vmatpush3.bf16.msra.mxu1 %v3052_v22 }
 0x172   : > { %808 = vmatprep.subr.bf16.mxu0 %v3032_v16  ;;  %2275 = vmatprep.subr.bf16.mxu1 %v2808_v3 }
 0x175   : > { %809 = vmatpush1.bf16.msra.mxu0 %v3040_v18  ;;  %2276 = vmatpush3.bf16.msra.mxu1 %v3072_v27 }
 0x176   : > { %810 = vmatprep.subr.bf16.mxu0 %v3049_v21  ;;  %2277 = vmatprep.subr.bf16.mxu1 %v2808_v3 }
 0x179   : > { %811 = vmatpush1.bf16.msra.mxu0 %v3063_v24  ;;  %2278 = vmatpush3.bf16.msra.mxu1 %v3086_v33 }
 0x17a   : > { %812 = vmatprep.subr.bf16.mxu0 %v3069_v26  ;;  %2279 = vmatprep.subr.bf16.mxu1 %v2808_v3 }
 0x17d   : > { %813 = vmatpush1.bf16.msra.mxu0 %v3079_v31  ;;  %2280 = vmatpush3.bf16.msra.mxu1 %v3104_v39 }
 0x17e   : > { %933 = vmatprep.subr.bf16.mxu0 %v2985_v1  ;;  %2285 = vmatprep.subr.bf16.mxu1 %v2808_v3 }
 0x220   : > { %v697_v59 = vpop.f32.mrf.mxu0  ;;  %v738_v61 = vpop.f32.mrf.mxu1 }
 0x221   : > { %v745_v0 = vadd.f32 %v744_v55, %v697_v59  ;;  %v760_v55 = vadd.f32 %v3209_v58, %v738_v61 }
 0x222   : > { %v699_v19 = vpop.f32.mrf.mxu0  ;;  %v2263_v20 = vpop.f32.mrf.mxu1 }
 0x223   : > { %v751_v23 = vmul.f32 0.5, %v745_v0  ;;  %v750_v41 = vadd.f32 %v749_v28, %v699_v19  ;;  %v3279_v0 = vpop.permute.xlu1 %1592 }
 0x224   : > { %v701_v29 = vpop.f32.mrf.mxu0  ;;  %v741_v37 = vpop.f32.mrf.mxu1 }
 0x225   : > { %2556 = vtanh.f32 %v751_v23  ;;  %v755_v45 = vmul.f32 0.5, %v750_v41 }
 0x226   : > { %v702_v40 = vpop.f32.mrf.mxu0  ;;  %v2264_v42 = vpop.f32.mrf.mxu1 }
 0x227   : > { %2558 = vtanh.f32 %v755_v45  ;;  %v3281_v23 = vpop.permute.xlu1 %1727  ;;  %v785_v45 = vmul.f32 %v783_v34, %v3227_v50 }
 0x22b   : > { %v3283_v29 = vpop.permute.xlu1 %1862 }
 0x22f   : > { %v791_v61 = vpop.permute.xlu1 %790 }
 0x232   : > { %v2557_v47 = vpop.eup %2556 }
 0x233   : > { %v753_v48 = vmul.f32 0.5, %v2557_v47 }
 0x234   : > { %v2559_v19 = vpop.eup %2558 }
 0x235   : > { %v754_v51 = vadd.f32 0.5, %v753_v48  ;;  %v757_v20 = vmul.f32 0.5, %v2559_v19 }
 0x237   : > { %v761_v56 = vmul.f32 %v760_v55, %v754_v51  ;;  %v758_v28 = vadd.f32 0.5, %v757_v20 }
 0x239   : > { %v762_v59 = vadd.f32 %v761_v56, %v759_v36  ;;  %v764_v37 = vsub.f32 1.0, %v758_v28  ;;  %v766_v60 = vmul.f32 %v758_v28, %v3227_v50  ;;  %v2104_v50 = vld [vmem:[%s2968_s19 + $0x18] sm:$0xff] }
 0x23a   : > { %v882_v34 = vrot.slane %v2104_v50, 4 }
 0x23b   : > { %2560 = vtanh.f32 %v762_v59 }
 0x248   : > { %v2561_v40 = vpop.eup %2560 }
 0x249   : > { %v765_v42 = vmul.f32 %v2561_v40, %v764_v37  ;;  %v884_v37 = vunpack.c.l.bf16 %v882_v34 }
 0x24b   : > { %v767_v41 = vadd.f32 %v766_v60, %v765_v42 }
 0x24d   : > { %v778_v47 = vmul.f32 %v776_v32, %v767_v41  ;;  %v793_v48 = vmul.f32 %v791_v61, %v767_v41  ;;  %v879_v32 = vunpack.c.l.bf16 %v2104_v50 }
 0x24f   : > { %v3287_v51 = vadd.f32 %v785_v45, %v778_v47  ;;  %1875 = vst [vmem:[%s2979_s9 + $0x8] sm:$0xff] %v793_v48  ;;  %v3329_v48 = vld [vmem:[%s2968_s19 + $0x20] ss:$12 sps:$4 sm:$0xff]  }
 0x251   : > { %v797_v36 = vpack.c.bf16 %v3287_v51, %v3287_v51 }
 0x253   : > { %831 = vmatmul.mubr.bf16.vlgmr.msra.gmra.mxu0 %v797_v36  ;;  %2282 = vmatmul.mubr.bf16.vlgmr.msra.gmra.mxu1 %v797_v36 }
 0x254   : > { %934 = vmatpush1.bf16.msra.mxu0 %v2987_v2  ;;  %2286 = vmatpush3.bf16.msra.mxu1 %v3004_v8 }
 0x255   : > { %935 = vmatprep.subr.bf16.mxu0 %v2992_v5  ;;  %2287 = vmatprep.subr.bf16.mxu1 %v2808_v3 }
 0x256   : > { %965 = vmatprep.mubr.bf16.mxu0 %v3747_v4  ;;  %2301 = vmatprep.mubr.msk.bf16.mxu1 %vm2810_vm0, %v2808_v3  ;;  %v894_v4 = vunpack.c.l.bf16 %v3329_v48 }
 0x258   : > { %936 = vmatpush1.bf16.msra.mxu0 %v2997_v6  ;;  %2288 = vmatpush3.bf16.msra.mxu1 %v3013_v11 }
 0x259   : > { %937 = vmatprep.subr.bf16.mxu0 %v3001_v7  ;;  %2289 = vmatprep.subr.bf16.mxu1 %v2808_v3 }
 0x25c   : > { %938 = vmatpush1.bf16.msra.mxu0 %v3007_v9  ;;  %2290 = vmatpush3.bf16.msra.mxu1 %v3023_v14 }
 0x25d   : > { %939 = vmatprep.subr.bf16.mxu0 %v3009_v10  ;;  %2291 = vmatprep.subr.bf16.mxu1 %v2808_v3 }
 0x260   : > { %940 = vmatpush1.bf16.msra.mxu0 %v3016_v12  ;;  %2292 = vmatpush3.bf16.msra.mxu1 %v3036_v17 }
 0x261   : > { %941 = vmatprep.subr.bf16.mxu0 %v3019_v13  ;;  %2293 = vmatprep.subr.bf16.mxu1 %v2808_v3 }
 0x264   : > { %942 = vmatpush1.bf16.msra.mxu0 %v3030_v15  ;;  %2294 = vmatpush3.bf16.msra.mxu1 %v3052_v22 }
 0x265   : > { %943 = vmatprep.subr.bf16.mxu0 %v3032_v16  ;;  %2295 = vmatprep.subr.bf16.mxu1 %v2808_v3 }
 0x268   : > { %944 = vmatpush1.bf16.msra.mxu0 %v3040_v18  ;;  %2296 = vmatpush3.bf16.msra.mxu1 %v3072_v27 }
 0x269   : > { %945 = vmatprep.subr.bf16.mxu0 %v3049_v21  ;;  %2297 = vmatprep.subr.bf16.mxu1 %v2808_v3 }
 0x26c   : > { %946 = vmatpush1.bf16.msra.mxu0 %v3063_v24  ;;  %2298 = vmatpush3.bf16.msra.mxu1 %v3086_v33 }
 0x26d   : > { %947 = vmatprep.subr.bf16.mxu0 %v3069_v26  ;;  %2299 = vmatprep.subr.bf16.mxu1 %v2808_v3 }
 0x270   : > { %948 = vmatpush1.bf16.msra.mxu0 %v3079_v31  ;;  %2300 = vmatpush3.bf16.msra.mxu1 %v3104_v39 }
 0x271   : > { %1068 = vmatprep.subr.bf16.mxu0 %v2985_v1  ;;  %2305 = vmatprep.subr.bf16.mxu1 %v2808_v3 }
 0x313   : > { %v832_v55 = vpop.f32.mrf.mxu0  ;;  %v873_v56 = vpop.f32.mrf.mxu1 }
 0x314   : > { %v880_v59 = vadd.f32 %v879_v32, %v832_v55  ;;  %v895_v32 = vadd.f32 %v3209_v58, %v873_v56 }
 0x315   : > { %v834_v19 = vpop.f32.mrf.mxu0  ;;  %v2283_v20 = vpop.f32.mrf.mxu1 }
 0x316   : > { %v886_v28 = vmul.f32 0.5, %v880_v59  ;;  %v885_v61 = vadd.f32 %v884_v37, %v834_v19 }
 0x317   : > { %v836_v40 = vpop.f32.mrf.mxu0  ;;  %v876_v42 = vpop.f32.mrf.mxu1 }
 0x318   : > { %2562 = vtanh.f32 %v886_v28  ;;  %v890_v45 = vmul.f32 0.5, %v885_v61  ;;  %v920_v61 = vmul.f32 %v3267_v54, %v3287_v51  ;;  %v3763_v54 = vmov 0  }
 0x319   : > { %v837_v60 = vpop.f32.mrf.mxu0  ;;  %v2284_v41 = vpop.f32.mrf.mxu1 }
 0x31a   : > { %2564 = vtanh.f32 %v890_v45  ;;  %v926_v41 = vpop.permute.xlu0 %925 }
 0x325   : > { %v2563_v47 = vpop.eup %2562 }
 0x326   : > { %v888_v36 = vmul.f32 0.5, %v2563_v47 }
 0x327   : > { %v2565_v59 = vpop.eup %2564 }
 0x328   : > { %v889_v50 = vadd.f32 0.5, %v888_v36  ;;  %v892_v20 = vmul.f32 0.5, %v2565_v59 }
 0x32a   : > { %v896_v55 = vmul.f32 %v895_v32, %v889_v50  ;;  %v893_v28 = vadd.f32 0.5, %v892_v20 }
 0x32c   : > { %v897_v34 = vadd.f32 %v896_v55, %v894_v4  ;;  %v899_v40 = vsub.f32 1.0, %v893_v28  ;;  %v901_v42 = vmul.f32 %v893_v28, %v3287_v51 }
 0x32e   : > { %2566 = vtanh.f32 %v897_v34 }
 0x33b   : > { %v2567_v19 = vpop.eup %2566 }
 0x33c   : > { %v900_v37 = vmul.f32 %v2567_v19, %v899_v40 }
 0x33e   : > { %v902_v60 = vadd.f32 %v901_v42, %v900_v37 }
 0x340   : > { %v913_v45 = vmul.f32 %v3198_v38, %v902_v60  ;;  %v928_v56 = vmul.f32 %v926_v41, %v902_v60  ;;  %v1029_v60 = vunpack.c.h.bf16 %v3329_v48 }
 0x342   : > { %1876 = vst [vmem:[%s2979_s9 + $0x10] sm:$0xff] %v928_v56  ;;  %v3338_v47 = vadd.f32 %v920_v61, %v913_v45 }
 0x344   : > { %v932_v4 = vpack.c.bf16 %v3338_v47, %v3338_v47  ;;  %v1055_v48 = vmul.f32 %v3269_v62, %v3338_v47  ;;  %v3404_v62 = vld [vmem:[#allocation6 + $0x7c] ss:$12 sps:$4 sm:$0xff]  }
 0x346   : > { %966 = vmatmul.mubr.bf16.vlgmr.msra.gmra.mxu0 %v932_v4  ;;  %2302 = vmatmul.mubr.bf16.vlgmr.msra.gmra.mxu1 %v932_v4 }
 0x347   : > { %1069 = vmatpush1.bf16.msra.mxu0 %v2987_v2  ;;  %2306 = vmatpush3.bf16.msra.mxu1 %v3004_v8  ;;  %v2107_v2 = vld [vmem:[%s2968_s19 + $0x24] sm:$0xff] }
 0x348   : > { %1070 = vmatprep.subr.bf16.mxu0 %v2992_v5  ;;  %2307 = vmatprep.subr.bf16.mxu1 %v2808_v3  ;;  %v1014_v5 = vunpack.c.l.bf16 %v2107_v2 }
 0x349   : > { %1100 = vmatprep.mubr.bf16.mxu0 %v3763_v54  ;;  %2321 = vmatprep.mubr.msk.bf16.mxu1 %vm2810_vm0, %v2808_v3 }
 0x34b   : > { %1071 = vmatpush1.bf16.msra.mxu0 %v2997_v6  ;;  %2308 = vmatpush3.bf16.msra.mxu1 %v3013_v11  ;;  %v1017_v6 = vrot.slane %v2107_v2, 4 }
 0x34c   : > { %1072 = vmatprep.subr.bf16.mxu0 %v3001_v7  ;;  %2309 = vmatprep.subr.bf16.mxu1 %v2808_v3 }
 0x34d   : > { %v1019_v55 = vunpack.c.l.bf16 %v1017_v6 }
 0x34f   : > { %1073 = vmatpush1.bf16.msra.mxu0 %v3007_v9  ;;  %2310 = vmatpush3.bf16.msra.mxu1 %v3023_v14 }
 0x350   : > { %1074 = vmatprep.subr.bf16.mxu0 %v3009_v10  ;;  %2311 = vmatprep.subr.bf16.mxu1 %v2808_v3 }
 0x353   : > { %1075 = vmatpush1.bf16.msra.mxu0 %v3016_v12  ;;  %2312 = vmatpush3.bf16.msra.mxu1 %v3036_v17 }
 0x354   : > { %1076 = vmatprep.subr.bf16.mxu0 %v3019_v13  ;;  %2313 = vmatprep.subr.bf16.mxu1 %v2808_v3 }
 0x357   : > { %1077 = vmatpush1.bf16.msra.mxu0 %v3030_v15  ;;  %2314 = vmatpush3.bf16.msra.mxu1 %v3052_v22 }
 0x358   : > { %1078 = vmatprep.subr.bf16.mxu0 %v3032_v16  ;;  %2315 = vmatprep.subr.bf16.mxu1 %v2808_v3 }
 0x35b   : > { %1079 = vmatpush1.bf16.msra.mxu0 %v3040_v18  ;;  %2316 = vmatpush3.bf16.msra.mxu1 %v3072_v27 }
 0x35c   : > { %1080 = vmatprep.subr.bf16.mxu0 %v3049_v21  ;;  %2317 = vmatprep.subr.bf16.mxu1 %v2808_v3 }
 0x35f   : > { %1081 = vmatpush1.bf16.msra.mxu0 %v3063_v24  ;;  %2318 = vmatpush3.bf16.msra.mxu1 %v3086_v33 }
 0x360   : > { %1082 = vmatprep.subr.bf16.mxu0 %v3069_v26  ;;  %2319 = vmatprep.subr.bf16.mxu1 %v2808_v3 }
 0x363   : > { %1083 = vmatpush1.bf16.msra.mxu0 %v3079_v31  ;;  %2320 = vmatpush3.bf16.msra.mxu1 %v3104_v39 }
 0x364   : > { %1203 = vmatprep.subr.bf16.mxu0 %v2985_v1  ;;  %2325 = vmatprep.subr.bf16.mxu1 %v2808_v3 }
 0x406   : > { %v967_v7 = vpop.f32.mrf.mxu0  ;;  %v1008_v38 = vpop.f32.mrf.mxu1 }
 0x407   : > { %v1015_v51 = vadd.f32 %v1014_v5, %v967_v7  ;;  %v1030_v41 = vadd.f32 %v3209_v58, %v1008_v38 }
 0x408   : > { %v969_v36 = vpop.f32.mrf.mxu0  ;;  %v2303_v50 = vpop.f32.mrf.mxu1 }
 0x409   : > { %v1021_v32 = vmul.f32 0.5, %v1015_v51  ;;  %v1020_v40 = vadd.f32 %v1019_v55, %v969_v36  ;;  %v1061_v50 = vpop.permute.xlu1 %1060 }
 0x40a   : > { %v971_v34 = vpop.f32.mrf.mxu0  ;;  %v1011_v59 = vpop.f32.mrf.mxu1 }
 0x40b   : > { %2568 = vtanh.f32 %v1021_v32  ;;  %v1025_v19 = vmul.f32 0.5, %v1020_v40  ;;  %v3389_v59 = vld [vmem:[#allocation6 + $0xa8] ss:$12 sps:$4 sm:$0xff]  }
 0x40c   : > { %v972_v20 = vpop.f32.mrf.mxu0  ;;  %v2304_v28 = vpop.f32.mrf.mxu1 }
 0x40d   : > { %2570 = vtanh.f32 %v1025_v19  ;;  %v3393_v20 = vld [vmem:[#allocation6 + $0x94] ss:$12 sps:$4 sm:$0xff]  }
 0x418   : > { %v2569_v1 = vpop.eup %2568 }
 0x419   : > { %v1023_v37 = vmul.f32 0.5, %v2569_v1 }
 0x41a   : > { %v2571_v56 = vpop.eup %2570 }
 0x41b   : > { %v1024_v42 = vadd.f32 0.5, %v1023_v37  ;;  %v1027_v4 = vmul.f32 0.5, %v2571_v56 }
 0x41d   : > { %v1031_v61 = vmul.f32 %v1030_v41, %v1024_v42  ;;  %v1028_v2 = vadd.f32 0.5, %v1027_v4 }
 0x41f   : > { %v1032_v45 = vadd.f32 %v1031_v61, %v1029_v60  ;;  %v1034_v5 = vsub.f32 1.0, %v1028_v2  ;;  %v1036_v51 = vmul.f32 %v1028_v2, %v3338_v47 }
 0x421   : > { %2572 = vtanh.f32 %v1032_v45 }
 0x42e   : > { %v2573_v6 = vpop.eup %2572 }
 0x42f   : > { %v1035_v7 = vmul.f32 %v2573_v6, %v1034_v5  ;;  %v1196_v5 = vpop.permute.xlu0 %1195 }
 0x431   : > { %v1037_v36 = vadd.f32 %v1036_v51, %v1035_v7 }
 0x433   : > { %v1048_v32 = vmul.f32 %v3200_v43, %v1037_v36  ;;  %v1063_v55 = vmul.f32 %v1061_v50, %v1037_v36  ;;  %v3400_v43 = vld [vmem:[#allocation6 + $0x90] ss:$12 sps:$4 sm:$0xff]  }
 0x435   : > { %1877 = vst [vmem:[%s2979_s9 + $0x18] sm:$0xff] %v1063_v55  ;;  %v3385_v38 = vadd.f32 %v1055_v48, %v1048_v32  ;;  %v3450_v32 = vld [vmem:[#allocation6 + $0xb0] ss:$12 sps:$4 sm:$0xff]   ;;  %v3467_v55 = vld [vmem:[#allocation6 + $0x80] ss:$12 sps:$4 sm:$0xff]  }
 0x436   : > { %v3470_v48 = vld [vmem:[#allocation6 + $0x64] ss:$12 sps:$4 sm:$0xff]  }
 0x437   : > { %v1067_v34 = vpack.c.bf16 %v3385_v38, %v3385_v38  ;;  %v1190_v51 = vmul.f32 %v3271_v44, %v3385_v38  ;;  %v3464_v44 = vld [vmem:[#allocation6 + $0x78] ss:$12 sps:$4 sm:$0xff]  }
 0x439   : > { %1101 = vmatmul.mubr.bf16.vlgmr.msra.gmra.mxu0 %v1067_v34  ;;  %2322 = vmatmul.mubr.bf16.vlgmr.msra.gmra.mxu1 %v1067_v34  ;;  %v3477_v34 = vld [vmem:[#allocation6 + $0x68] ss:$12 sps:$4 sm:$0xff]  }
 0x43a   : > { %1204 = vmatpush1.bf16.msra.mxu0 %v3389_v59  ;;  %2326 = vmatpush3.bf16.msra.mxu1 %v3004_v8  ;;  %v3430_v8 = vld [vmem:[#allocation6 + $0xac] ss:$12 sps:$4 sm:$0xff]  }
 0x43b   : > { %1205 = vmatprep.subr.bf16.mxu0 %v3393_v20  ;;  %2327 = vmatprep.subr.bf16.mxu1 %v2808_v3 }
 0x43c   : > { %1235 = vmatprep.mubr.bf16.mxu0 %v3763_v54  ;;  %2341 = vmatprep.mubr.msk.bf16.mxu1 %vm2810_vm0, %v2808_v3 }
 0x43e   : > { %1206 = vmatpush1.bf16.msra.mxu0 %v3400_v43  ;;  %2328 = vmatpush3.bf16.msra.mxu1 %v3013_v11 }
 0x43f   : > { %1207 = vmatprep.subr.bf16.mxu0 %v3404_v62  ;;  %2329 = vmatprep.subr.bf16.mxu1 %v2808_v3 }
 0x442   : > { %1208 = vmatpush1.bf16.msra.mxu0 %v3007_v9  ;;  %2330 = vmatpush3.bf16.msra.mxu1 %v3023_v14  ;;  %v2110_v9 = vld [vmem:[%s2968_s19 + $0x30] sm:$0xff] }
 0x443   : > { %1209 = vmatprep.subr.bf16.mxu0 %v3009_v10  ;;  %2331 = vmatprep.subr.bf16.mxu1 %v2808_v3  ;;  %v1149_v10 = vunpack.c.l.bf16 %v2110_v9  ;;  %v1152_v11 = vrot.slane %v2110_v9, 4  ;;  %v3480_v9 = vld [vmem:[#allocation6 + $0x4c] ss:$12 sps:$4 sm:$0xff]  }
 0x446   : > { %1210 = vmatpush1.bf16.msra.mxu0 %v3016_v12  ;;  %2332 = vmatpush3.bf16.msra.mxu1 %v3036_v17 }
 0x447   : > { %1211 = vmatprep.subr.bf16.mxu0 %v3019_v13  ;;  %2333 = vmatprep.subr.bf16.mxu1 %v2808_v3 }
 0x44a   : > { %1212 = vmatpush1.bf16.msra.mxu0 %v3030_v15  ;;  %2334 = vmatpush3.bf16.msra.mxu1 %v3052_v22 }
 0x44b   : > { %1213 = vmatprep.subr.bf16.mxu0 %v3032_v16  ;;  %2335 = vmatprep.subr.bf16.mxu1 %v2808_v3 }
 0x44e   : > { %1214 = vmatpush1.bf16.msra.mxu0 %v3040_v18  ;;  %2336 = vmatpush3.bf16.msra.mxu1 %v3072_v27  ;;  %v1154_v18 = vunpack.c.l.bf16 %v1152_v11  ;;  %v3487_v11 = vld [vmem:[#allocation6 + $0x50] ss:$12 sps:$4 sm:$0xff]  }
 0x44f   : > { %1215 = vmatprep.subr.bf16.mxu0 %v3049_v21  ;;  %2337 = vmatprep.subr.bf16.mxu1 %v2808_v3 }
 0x452   : > { %1216 = vmatpush1.bf16.msra.mxu0 %v3063_v24  ;;  %2338 = vmatpush3.bf16.msra.mxu1 %v3086_v33 }
 0x453   : > { %1217 = vmatprep.subr.bf16.mxu0 %v3069_v26  ;;  %2339 = vmatprep.subr.bf16.mxu1 %v2808_v3 }
 0x456   : > { %1218 = vmatpush1.bf16.msra.mxu0 %v3079_v31  ;;  %2340 = vmatpush3.bf16.msra.mxu1 %v3104_v39  ;;  %v3436_v39 = vld [vmem:[%s2968_s19 + $0x38] ss:$12 sps:$4 sm:$0xff]  }
 0x457   : > { %1338 = vmatprep.subr.bf16.mxu0 %v3430_v8  ;;  %2345 = vmatprep.subr.bf16.mxu1 %v2808_v3  ;;  %v1164_v40 = vunpack.c.l.bf16 %v3436_v39 }
 0x4f9   : > { %v1102_v12 = vpop.f32.mrf.mxu0  ;;  %v1143_v13 = vpop.f32.mrf.mxu1 }
 0x4fa   : > { %v1150_v14 = vadd.f32 %v1149_v10, %v1102_v12  ;;  %v1165_v19 = vadd.f32 %v3209_v58, %v1143_v13  ;;  %v3484_v10 = vld [vmem:[#allocation6 + $0x48] ss:$12 sps:$4 sm:$0xff]   ;;  %v3494_v13 = vld [vmem:[#allocation6 + $0x30] ss:$12 sps:$4 sm:$0xff]  }
 0x4fb   : > { %v1104_v15 = vpop.f32.mrf.mxu0  ;;  %v2323_v16 = vpop.f32.mrf.mxu1  ;;  %v3490_v12 = vld [vmem:[#allocation6 + $0x34] ss:$12 sps:$4 sm:$0xff]  }
 0x4fc   : > { %v1156_v17 = vmul.f32 0.5, %v1150_v14  ;;  %v1155_v27 = vadd.f32 %v1154_v18, %v1104_v15  ;;  %v3497_v14 = vld [vmem:[#allocation6 + $0x38] ss:$12 sps:$4 sm:$0xff]   ;;  %v3500_v15 = vld [vmem:[#allocation6 + $0x1c] ss:$12 sps:$4 sm:$0xff]  }
 0x4fd   : > { %v1106_v21 = vpop.f32.mrf.mxu0  ;;  %v1146_v22 = vpop.f32.mrf.mxu1  ;;  %v3504_v16 = vld [vmem:[#allocation6 + $0x18] ss:$12 sps:$4 sm:$0xff]  }
 0x4fe   : > { %2574 = vtanh.f32 %v1156_v17  ;;  %v1160_v31 = vmul.f32 0.5, %v1155_v27  ;;  %v3507_v17 = vld [vmem:[#allocation6 + $0x20] ss:$12 sps:$4 sm:$0xff]   ;;  %v3510_v18 = vld [vmem:[#allocation6 + $0x4] ss:$12 sps:$4 sm:$0xff]  }
 0x4ff   : > { %v1107_v24 = vpop.f32.mrf.mxu0  ;;  %v2324_v26 = vpop.f32.mrf.mxu1  ;;  %v3514_v21 = vld [vmem:[#allocation6] ss:$12 sps:$4 sm:$0xff]   ;;  %v3517_v22 = vld [vmem:[#allocation6 + $0x8] ss:$12 sps:$4 sm:$0xff]  }
 0x500   : > { %2576 = vtanh.f32 %v1160_v31  ;;  %v2113_v24 = vld [vmem:[%s2968_s19 + $0x3c] sm:$0xff] }
 0x501   : > { %v1284_v26 = vunpack.c.l.bf16 %v2113_v24  ;;  %v1287_v27 = vrot.slane %v2113_v24, 4 }
 0x50b   : > { %v2575_v33 = vpop.eup %2574 }
 0x50c   : > { %v1158_v47 = vmul.f32 0.5, %v2575_v33 }
 0x50d   : > { %v2577_v42 = vpop.eup %2576 }
 0x50e   : > { %v1159_v28 = vadd.f32 0.5, %v1158_v47  ;;  %v1162_v60 = vmul.f32 0.5, %v2577_v42 }
 0x510   : > { %v1166_v1 = vmul.f32 %v1165_v19, %v1159_v28  ;;  %v1163_v41 = vadd.f32 0.5, %v1162_v60 }
 0x512   : > { %v1167_v37 = vadd.f32 %v1166_v1, %v1164_v40  ;;  %v1169_v61 = vsub.f32 1.0, %v1163_v41  ;;  %v1171_v4 = vmul.f32 %v1163_v41, %v3385_v38  ;;  %v3474_v38 = vld [vmem:[#allocation6 + $0x60] ss:$12 sps:$4 sm:$0xff]   ;;  %v1289_v1 = vunpack.c.l.bf16 %v1287_v27 }
 0x514   : > { %2578 = vtanh.f32 %v1167_v37 }
 0x521   : > { %v2579_v45 = vpop.eup %2578 }
 0x522   : > { %v1170_v56 = vmul.f32 %v2579_v45, %v1169_v61 }
 0x524   : > { %v1172_v2 = vadd.f32 %v1171_v4, %v1170_v56 }
 0x526   : > { %v1183_v6 = vmul.f32 %v3202_v52, %v1172_v2  ;;  %v1198_v7 = vmul.f32 %v1196_v5, %v1172_v2  ;;  %v3459_v52 = vld [vmem:[#allocation6 + $0x98] ss:$12 sps:$4 sm:$0xff]   ;;  %v1299_v5 = vunpack.c.h.bf16 %v3436_v39 }
 0x528   : > { %1878 = vst [vmem:[%s2979_s9 + $0x20] sm:$0xff] %v1198_v7  ;;  %v3445_v36 = vadd.f32 %v1190_v51, %v1183_v6 }
 0x52a   : > { %v1202_v50 = vpack.c.bf16 %v3445_v36, %v3445_v36  ;;  %v1325_v39 = vmul.f32 %v3273_v46, %v3445_v36 }
 0x52c   : > { %1236 = vmatmul.mubr.bf16.vlgmr.msra.gmra.mxu0 %v1202_v50  ;;  %2342 = vmatmul.mubr.bf16.vlgmr.msra.gmra.mxu1 %v1202_v50 }
 0x52d   : > { %1339 = vmatpush1.bf16.msra.mxu0 %v3389_v59  ;;  %2346 = vmatpush3.bf16.msra.mxu1 %v3450_v32 }
 0x52e   : > { %1340 = vmatprep.subr.bf16.mxu0 %v3393_v20  ;;  %2347 = vmatprep.subr.bf16.mxu1 %v2808_v3 }
 0x52f   : > { %1370 = vmatprep.mubr.bf16.mxu0 %v3763_v54  ;;  %2361 = vmatprep.mubr.msk.bf16.mxu1 %vm2810_vm0, %v2808_v3 }
 0x531   : > { %1341 = vmatpush1.bf16.msra.mxu0 %v3400_v43  ;;  %2348 = vmatpush3.bf16.msra.mxu1 %v3459_v52 }
 0x532   : > { %1342 = vmatprep.subr.bf16.mxu0 %v3404_v62  ;;  %2349 = vmatprep.subr.bf16.mxu1 %v2808_v3 }
 0x535   : > { %1343 = vmatpush1.bf16.msra.mxu0 %v3464_v44  ;;  %2350 = vmatpush3.bf16.msra.mxu1 %v3467_v55 }
 0x536   : > { %1344 = vmatprep.subr.bf16.mxu0 %v3470_v48  ;;  %2351 = vmatprep.subr.bf16.mxu1 %v2808_v3 }
 0x539   : > { %1345 = vmatpush1.bf16.msra.mxu0 %v3474_v38  ;;  %2352 = vmatpush3.bf16.msra.mxu1 %v3477_v34 }
 0x53a   : > { %1346 = vmatprep.subr.bf16.mxu0 %v3480_v9  ;;  %2353 = vmatprep.subr.bf16.mxu1 %v2808_v3 }
 0x53d   : > { %1347 = vmatpush1.bf16.msra.mxu0 %v3484_v10  ;;  %2354 = vmatpush3.bf16.msra.mxu1 %v3487_v11 }
 0x53e   : > { %1348 = vmatprep.subr.bf16.mxu0 %v3490_v12  ;;  %2355 = vmatprep.subr.bf16.mxu1 %v2808_v3 }
 0x541   : > { %1349 = vmatpush1.bf16.msra.mxu0 %v3494_v13  ;;  %2356 = vmatpush3.bf16.msra.mxu1 %v3497_v14 }
 0x542   : > { %1350 = vmatprep.subr.bf16.mxu0 %v3500_v15  ;;  %2357 = vmatprep.subr.bf16.mxu1 %v2808_v3 }
 0x545   : > { %1351 = vmatpush1.bf16.msra.mxu0 %v3504_v16  ;;  %2358 = vmatpush3.bf16.msra.mxu1 %v3507_v17 }
 0x546   : > { %1352 = vmatprep.subr.bf16.mxu0 %v3510_v18  ;;  %2359 = vmatprep.subr.bf16.mxu1 %v2808_v3 }
 0x549   : > { %1353 = vmatpush1.bf16.msra.mxu0 %v3514_v21  ;;  %2360 = vmatpush3.bf16.msra.mxu1 %v3517_v22 }
 0x54a   : > { %1473 = vmatprep.subr.bf16.mxu0 %v3430_v8  ;;  %2365 = vmatprep.subr.bf16.mxu1 %v2808_v3 }
 0x5ec   : > { %v1237_v31 = vpop.f32.mrf.mxu0  ;;  %v1278_v33 = vpop.f32.mrf.mxu1 }
 0x5ed   : > { %v1285_v47 = vadd.f32 %v1284_v26, %v1237_v31  ;;  %v1300_v6 = vadd.f32 %v3209_v58, %v1278_v33 }
 0x5ee   : > { %v1239_v28 = vpop.f32.mrf.mxu0  ;;  %v2343_v40 = vpop.f32.mrf.mxu1 }
 0x5ef   : > { %v1291_v19 = vmul.f32 0.5, %v1285_v47  ;;  %v1290_v61 = vadd.f32 %v1289_v1, %v1239_v28 }
 0x5f0   : > { %v1241_v37 = vpop.f32.mrf.mxu0  ;;  %v1281_v42 = vpop.f32.mrf.mxu1 }
 0x5f1   : > { %2580 = vtanh.f32 %v1291_v19  ;;  %v1295_v45 = vmul.f32 0.5, %v1290_v61  ;;  %v1331_v19 = vpop.permute.xlu1 %1330 }
 0x5f2   : > { %v1242_v60 = vpop.f32.mrf.mxu0  ;;  %v2344_v41 = vpop.f32.mrf.mxu1 }
 0x5f3   : > { %2582 = vtanh.f32 %v1295_v45 }
 0x5fe   : > { %v2581_v56 = vpop.eup %2580 }
 0x5ff   : > { %v1293_v4 = vmul.f32 0.5, %v2581_v56 }
 0x600   : > { %v2583_v50 = vpop.eup %2582 }
 0x601   : > { %v1294_v2 = vadd.f32 0.5, %v1293_v4  ;;  %v1297_v24 = vmul.f32 0.5, %v2583_v50 }
 0x603   : > { %v1301_v7 = vmul.f32 %v1300_v6, %v1294_v2  ;;  %v1298_v26 = vadd.f32 0.5, %v1297_v24 }
 0x605   : > { %v1302_v51 = vadd.f32 %v1301_v7, %v1299_v5  ;;  %v1304_v27 = vsub.f32 1.0, %v1298_v26  ;;  %v1306_v28 = vmul.f32 %v1298_v26, %v3445_v36 }
 0x607   : > { %2584 = vtanh.f32 %v1302_v51 }
 0x614   : > { %v2585_v31 = vpop.eup %2584 }
 0x615   : > { %v1305_v47 = vmul.f32 %v2585_v31, %v1304_v27  ;;  %v3571_v27 = vld [vmem:[%s2968_s19 + $0x50] ss:$12 sps:$4 sm:$0xff]  }
 0x617   : > { %v1307_v40 = vadd.f32 %v1306_v28, %v1305_v47  ;;  %v1434_v28 = vunpack.c.l.bf16 %v3571_v27 }
 0x619   : > { %v1318_v1 = vmul.f32 %v3204_v57, %v1307_v40  ;;  %v1333_v37 = vmul.f32 %v1331_v19, %v1307_v40  ;;  %v2116_v57 = vld [vmem:[%s2968_s19 + $0x48] sm:$0xff] }
 0x61a   : > { %v1419_v46 = vunpack.c.l.bf16 %v2116_v57  ;;  %v1422_v36 = vrot.slane %v2116_v57, 4 }
 0x61b   : > { %1879 = vst [vmem:[%s2979_s9 + $0x28] sm:$0xff] %v1333_v37  ;;  %v3530_v33 = vadd.f32 %v1325_v39, %v1318_v1 }
 0x61c   : > { %v1424_v2 = vunpack.c.l.bf16 %v1422_v36 }
 0x61d   : > { %v1337_v42 = vpack.c.bf16 %v3530_v33, %v3530_v33 }
 0x61f   : > { %1371 = vmatmul.mubr.bf16.vlgmr.msra.gmra.mxu0 %v1337_v42  ;;  %2362 = vmatmul.mubr.bf16.vlgmr.msra.gmra.mxu1 %v1337_v42 }
 0x620   : > { %1474 = vmatpush1.bf16.msra.mxu0 %v3389_v59  ;;  %2366 = vmatpush3.bf16.msra.mxu1 %v3450_v32 }
 0x621   : > { %1475 = vmatprep.subr.bf16.mxu0 %v3393_v20  ;;  %2367 = vmatprep.subr.bf16.mxu1 %v2808_v3 }
 0x622   : > { %1505 = vmatprep.mubr.bf16.mxu0 %v3763_v54  ;;  %2381 = vmatprep.mubr.msk.bf16.mxu1 %vm2810_vm0, %v2808_v3 }
 0x624   : > { %1476 = vmatpush1.bf16.msra.mxu0 %v3400_v43  ;;  %2368 = vmatpush3.bf16.msra.mxu1 %v3459_v52 }
 0x625   : > { %1477 = vmatprep.subr.bf16.mxu0 %v3404_v62  ;;  %2369 = vmatprep.subr.bf16.mxu1 %v2808_v3 }
 0x628   : > { %1478 = vmatpush1.bf16.msra.mxu0 %v3464_v44  ;;  %2370 = vmatpush3.bf16.msra.mxu1 %v3467_v55 }
 0x629   : > { %1479 = vmatprep.subr.bf16.mxu0 %v3470_v48  ;;  %2371 = vmatprep.subr.bf16.mxu1 %v2808_v3 }
 0x62c   : > { %1480 = vmatpush1.bf16.msra.mxu0 %v3474_v38  ;;  %2372 = vmatpush3.bf16.msra.mxu1 %v3477_v34 }
 0x62d   : > { %1481 = vmatprep.subr.bf16.mxu0 %v3480_v9  ;;  %2373 = vmatprep.subr.bf16.mxu1 %v2808_v3 }
 0x630   : > { %1482 = vmatpush1.bf16.msra.mxu0 %v3484_v10  ;;  %2374 = vmatpush3.bf16.msra.mxu1 %v3487_v11 }
 0x631   : > { %1483 = vmatprep.subr.bf16.mxu0 %v3490_v12  ;;  %2375 = vmatprep.subr.bf16.mxu1 %v2808_v3 }
 0x634   : > { %1484 = vmatpush1.bf16.msra.mxu0 %v3494_v13  ;;  %2376 = vmatpush3.bf16.msra.mxu1 %v3497_v14 }
 0x635   : > { %1485 = vmatprep.subr.bf16.mxu0 %v3500_v15  ;;  %2377 = vmatprep.subr.bf16.mxu1 %v2808_v3 }
 0x638   : > { %1486 = vmatpush1.bf16.msra.mxu0 %v3504_v16  ;;  %2378 = vmatpush3.bf16.msra.mxu1 %v3507_v17 }
 0x639   : > { %1487 = vmatprep.subr.bf16.mxu0 %v3510_v18  ;;  %2379 = vmatprep.subr.bf16.mxu1 %v2808_v3 }
 0x63c   : > { %1488 = vmatpush1.bf16.msra.mxu0 %v3514_v21  ;;  %2380 = vmatpush3.bf16.msra.mxu1 %v3517_v22 }
 0x63d   : > { %1608 = vmatprep.subr.bf16.mxu0 %v3430_v8  ;;  %2385 = vmatprep.subr.bf16.mxu1 %v2808_v3 }
 0x6df   : > { %v1372_v60 = vpop.f32.mrf.mxu0  ;;  %v1413_v41 = vpop.f32.mrf.mxu1 }
 0x6e0   : > { %v1420_v61 = vadd.f32 %v1419_v46, %v1372_v60  ;;  %v1435_v40 = vadd.f32 %v3209_v58, %v1413_v41  ;;  %v1460_v58 = vmul.f32 %v3275_v49, %v3530_v33 }
 0x6e1   : > { %v1374_v45 = vpop.f32.mrf.mxu0  ;;  %v2363_v56 = vpop.f32.mrf.mxu1 }
 0x6e2   : > { %v1426_v4 = vmul.f32 0.5, %v1420_v61  ;;  %v1425_v50 = vadd.f32 %v1424_v2, %v1374_v45  ;;  %v1466_v45 = vpop.permute.xlu0 %1465 }
 0x6e3   : > { %v1376_v5 = vpop.f32.mrf.mxu0  ;;  %v1416_v6 = vpop.f32.mrf.mxu1 }
 0x6e4   : > { %2586 = vtanh.f32 %v1426_v4  ;;  %v1430_v24 = vmul.f32 0.5, %v1425_v50 }
 0x6e5   : > { %v1377_v7 = vpop.f32.mrf.mxu0  ;;  %v2364_v51 = vpop.f32.mrf.mxu1 }
 0x6e6   : > { %2588 = vtanh.f32 %v1430_v24 }
 0x6f1   : > { %v2587_v26 = vpop.eup %2586 }
 0x6f2   : > { %v1428_v31 = vmul.f32 0.5, %v2587_v26 }
 0x6f3   : > { %v2589_v37 = vpop.eup %2588 }
 0x6f4   : > { %v1429_v47 = vadd.f32 0.5, %v1428_v31  ;;  %v1432_v39 = vmul.f32 0.5, %v2589_v37 }
 0x6f6   : > { %v1436_v19 = vmul.f32 %v1435_v40, %v1429_v47  ;;  %v1433_v42 = vadd.f32 0.5, %v1432_v39 }
 0x6f8   : > { %v1437_v1 = vadd.f32 %v1436_v19, %v1434_v28  ;;  %v1439_v57 = vsub.f32 1.0, %v1433_v42  ;;  %v1441_v60 = vmul.f32 %v1433_v42, %v3530_v33  ;;  %v1569_v42 = vunpack.c.h.bf16 %v3571_v27 }
 0x6fa   : > { %2590 = vtanh.f32 %v1437_v1 }
 0x707   : > { %v2591_v46 = vpop.eup %2590 }
 0x708   : > { %v1440_v36 = vmul.f32 %v2591_v46, %v1439_v57  ;;  %v3624_v57 = vld [vmem:[%s3740_s4] ss:$0 sm:$0xff] }
 0x70a   : > { %v1442_v61 = vadd.f32 %v1441_v60, %v1440_v36 }
 0x70c   : > { %v1453_v56 = vmul.f32 %v3215_v63, %v1442_v61  ;;  %v1468_v4 = vmul.f32 %v1466_v45, %v1442_v61  ;;  %v2119_v63 = vld [vmem:[%s2968_s19 + $0x54] sm:$0xff] }
 0x70d   : > { %v1554_v49 = vunpack.c.l.bf16 %v2119_v63  ;;  %v1557_v33 = vrot.slane %v2119_v63, 4 }
 0x70e   : > { %1880 = vst [vmem:[%s2979_s9 + $0x30] sm:$0xff] %v1468_v4  ;;  %v3580_v41 = vadd.f32 %v1460_v58, %v1453_v56 }
 0x70f   : > { %v1559_v26 = vunpack.c.l.bf16 %v1557_v33 }
 0x710   : > { %v1472_v2 = vpack.c.bf16 %v3580_v41, %v3580_v41 }
 0x712   : > { %1506 = vmatmul.mubr.bf16.vlgmr.msra.gmra.mxu0 %v1472_v2  ;;  %2382 = vmatmul.mubr.bf16.vlgmr.msra.gmra.mxu1 %v1472_v2 }
 0x713   : > { %1609 = vmatpush1.bf16.msra.mxu0 %v3389_v59  ;;  %2386 = vmatpush3.bf16.msra.mxu1 %v3450_v32 }
 0x714   : > { %1610 = vmatprep.subr.bf16.mxu0 %v3393_v20  ;;  %2387 = vmatprep.subr.bf16.mxu1 %v2808_v3 }
 0x715   : > { %1640 = vmatprep.mubr.bf16.mxu0 %v3763_v54  ;;  %2401 = vmatprep.mubr.msk.bf16.mxu1 %vm2810_vm0, %v2808_v3 }
 0x717   : > { %1611 = vmatpush1.bf16.msra.mxu0 %v3400_v43  ;;  %2388 = vmatpush3.bf16.msra.mxu1 %v3459_v52 }
 0x718   : > { %1612 = vmatprep.subr.bf16.mxu0 %v3404_v62  ;;  %2389 = vmatprep.subr.bf16.mxu1 %v2808_v3 }
 0x71b   : > { %1613 = vmatpush1.bf16.msra.mxu0 %v3464_v44  ;;  %2390 = vmatpush3.bf16.msra.mxu1 %v3467_v55 }
 0x71c   : > { %1614 = vmatprep.subr.bf16.mxu0 %v3470_v48  ;;  %2391 = vmatprep.subr.bf16.mxu1 %v2808_v3 }
 0x71f   : > { %1615 = vmatpush1.bf16.msra.mxu0 %v3474_v38  ;;  %2392 = vmatpush3.bf16.msra.mxu1 %v3477_v34 }
 0x720   : > { %1616 = vmatprep.subr.bf16.mxu0 %v3480_v9  ;;  %2393 = vmatprep.subr.bf16.mxu1 %v2808_v3 }
 0x723   : > { %1617 = vmatpush1.bf16.msra.mxu0 %v3484_v10  ;;  %2394 = vmatpush3.bf16.msra.mxu1 %v3487_v11 }
 0x724   : > { %1618 = vmatprep.subr.bf16.mxu0 %v3490_v12  ;;  %2395 = vmatprep.subr.bf16.mxu1 %v2808_v3 }
 0x727   : > { %1619 = vmatpush1.bf16.msra.mxu0 %v3494_v13  ;;  %2396 = vmatpush3.bf16.msra.mxu1 %v3497_v14 }
 0x728   : > { %1620 = vmatprep.subr.bf16.mxu0 %v3500_v15  ;;  %2397 = vmatprep.subr.bf16.mxu1 %v2808_v3 }
 0x72b   : > { %1621 = vmatpush1.bf16.msra.mxu0 %v3504_v16  ;;  %2398 = vmatpush3.bf16.msra.mxu1 %v3507_v17 }
 0x72c   : > { %1622 = vmatprep.subr.bf16.mxu0 %v3510_v18  ;;  %2399 = vmatprep.subr.bf16.mxu1 %v2808_v3 }
 0x72f   : > { %1623 = vmatpush1.bf16.msra.mxu0 %v3514_v21  ;;  %2400 = vmatpush3.bf16.msra.mxu1 %v3517_v22 }
 0x730   : > { %1743 = vmatprep.subr.bf16.mxu0 %v3430_v8  ;;  %2405 = vmatprep.subr.bf16.mxu1 %v2808_v3 }
 0x7d2   : > { %v1507_v5 = vpop.f32.mrf.mxu0  ;;  %v1548_v6 = vpop.f32.mrf.mxu1 }
 0x7d3   : > { %v1555_v7 = vadd.f32 %v1554_v49, %v1507_v5  ;;  %v1570_v46 = vadd.f32 %v3624_v57, %v1548_v6  ;;  %v1601_v49 = vpop.permute.xlu1 %1600  ;;  %v1595_v6 = vmul.f32 %v3279_v0, %v3580_v41 }
 0x7d4   : > { %v1509_v51 = vpop.f32.mrf.mxu0  ;;  %v2383_v50 = vpop.f32.mrf.mxu1 }
 0x7d5   : > { %v1561_v24 = vmul.f32 0.5, %v1555_v7  ;;  %v1560_v19 = vadd.f32 %v1559_v26, %v1509_v51 }
 0x7d6   : > { %v1511_v31 = vpop.f32.mrf.mxu0  ;;  %v1551_v47 = vpop.f32.mrf.mxu1 }
 0x7d7   : > { %2592 = vtanh.f32 %v1561_v24  ;;  %v1565_v1 = vmul.f32 0.5, %v1560_v19  ;;  %v1736_v47 = vpop.permute.xlu0 %1735 }
 0x7d8   : > { %v1512_v28 = vpop.f32.mrf.mxu0  ;;  %v2384_v40 = vpop.f32.mrf.mxu1 }
 0x7d9   : > { %2594 = vtanh.f32 %v1565_v1 }
 0x7e4   : > { %v2593_v8 = vpop.eup %2592 }
 0x7e5   : > { %v1563_v37 = vmul.f32 0.5, %v2593_v8 }
 0x7e6   : > { %v2595_v61 = vpop.eup %2594 }
 0x7e7   : > { %v1564_v39 = vadd.f32 0.5, %v1563_v37  ;;  %v1567_v45 = vmul.f32 0.5, %v2595_v61  ;;  %v2125_v37 = vld [vmem:[%s2968_s19 + $0x6c] sm:$0xff] }
 0x7e9   : > { %v1571_v36 = vmul.f32 %v1570_v46, %v1564_v39  ;;  %v1568_v56 = vadd.f32 0.5, %v1567_v45  ;;  %v1824_v39 = vunpack.c.l.bf16 %v2125_v37 }
 0x7eb   : > { %v1572_v60 = vadd.f32 %v1571_v36, %v1569_v42  ;;  %v1574_v4 = vsub.f32 1.0, %v1568_v56  ;;  %v1576_v63 = vmul.f32 %v1568_v56, %v3580_v41  ;;  %v1827_v42 = vrot.slane %v2125_v37, 4 }
 0x7ed   : > { %2596 = vtanh.f32 %v1572_v60 }
 0x7fa   : > { %v2597_v58 = vpop.eup %2596 }
 0x7fb   : > { %v1575_v2 = vmul.f32 %v2597_v58, %v1574_v4  ;;  %v1829_v4 = vunpack.c.l.bf16 %v1827_v42 }
 0x7fd   : > { %v1577_v27 = vadd.f32 %v1576_v63, %v1575_v2 }
 0x7ff   : > { %v1588_v33 = vmul.f32 %v3218_v25, %v1577_v27  ;;  %v1603_v5 = vmul.f32 %v1601_v49, %v1577_v27  ;;  %v2122_v25 = vld [vmem:[%s2968_s19 + $0x60] sm:$0xff] }
 0x800   : > { %v1689_v0 = vunpack.c.l.bf16 %v2122_v25 }
 0x801   : > { %1881 = vst [vmem:[%s2979_s9 + $0x38] sm:$0xff] %v1603_v5  ;;  %v3632_v7 = vadd.f32 %v1595_v6, %v1588_v33 }
 0x803   : > { %v1607_v51 = vpack.c.bf16 %v3632_v7, %v3632_v7  ;;  %v1730_v19 = vmul.f32 %v3281_v23, %v3632_v7 }
 0x805   : > { %1641 = vmatmul.mubr.bf16.vlgmr.msra.gmra.mxu0 %v1607_v51  ;;  %2402 = vmatmul.mubr.bf16.vlgmr.msra.gmra.mxu1 %v1607_v51 }
 0x806   : > { %1744 = vmatpush1.bf16.msra.mxu0 %v3389_v59  ;;  %2406 = vmatpush3.bf16.msra.mxu1 %v3450_v32 }
 0x807   : > { %1745 = vmatprep.subr.bf16.mxu0 %v3393_v20  ;;  %2407 = vmatprep.subr.bf16.mxu1 %v2808_v3 }
 0x808   : > { %1775 = vmatprep.mubr.bf16.mxu0 %v3763_v54  ;;  %2421 = vmatprep.mubr.msk.bf16.mxu1 %vm2810_vm0, %v2808_v3  ;;  %v1692_v54 = vrot.slane %v2122_v25, 4 }
 0x80a   : > { %1746 = vmatpush1.bf16.msra.mxu0 %v3400_v43  ;;  %2408 = vmatpush3.bf16.msra.mxu1 %v3459_v52 }
 0x80b   : > { %1747 = vmatprep.subr.bf16.mxu0 %v3404_v62  ;;  %2409 = vmatprep.subr.bf16.mxu1 %v2808_v3 }
 0x80e   : > { %1748 = vmatpush1.bf16.msra.mxu0 %v3464_v44  ;;  %2410 = vmatpush3.bf16.msra.mxu1 %v3467_v55  ;;  %v1694_v44 = vunpack.c.l.bf16 %v1692_v54 }
 0x80f   : > { %1749 = vmatprep.subr.bf16.mxu0 %v3470_v48  ;;  %2411 = vmatprep.subr.bf16.mxu1 %v2808_v3 }
 0x812   : > { %1750 = vmatpush1.bf16.msra.mxu0 %v3474_v38  ;;  %2412 = vmatpush3.bf16.msra.mxu1 %v3477_v34 }
 0x813   : > { %1751 = vmatprep.subr.bf16.mxu0 %v3480_v9  ;;  %2413 = vmatprep.subr.bf16.mxu1 %v2808_v3 }
 0x816   : > { %1752 = vmatpush1.bf16.msra.mxu0 %v3484_v10  ;;  %2414 = vmatpush3.bf16.msra.mxu1 %v3487_v11  ;;  %v2123_v11 = vld [vmem:[%s2968_s19 + $0x68] ss:$12 sps:$4 sm:$0xff]  }
 0x817   : > { %1753 = vmatprep.subr.bf16.mxu0 %v3490_v12  ;;  %2415 = vmatprep.subr.bf16.mxu1 %v2808_v3  ;;  %v1839_v6 = vunpack.c.h.bf16 %v2123_v11 }
 0x81a   : > { %1754 = vmatpush1.bf16.msra.mxu0 %v3494_v13  ;;  %2416 = vmatpush3.bf16.msra.mxu1 %v3497_v14  ;;  %v1704_v14 = vunpack.c.l.bf16 %v2123_v11 }
 0x81b   : > { %1755 = vmatprep.subr.bf16.mxu0 %v3500_v15  ;;  %2417 = vmatprep.subr.bf16.mxu1 %v2808_v3 }
 0x81e   : > { %1756 = vmatpush1.bf16.msra.mxu0 %v3504_v16  ;;  %2418 = vmatpush3.bf16.msra.mxu1 %v3507_v17 }
 0x81f   : > { %1757 = vmatprep.subr.bf16.mxu0 %v3510_v18  ;;  %2419 = vmatprep.subr.bf16.mxu1 %v2808_v3 }
 0x822   : > { %1758 = vmatpush1.bf16.msra.mxu0 %v3514_v21  ;;  %2420 = vmatpush3.bf16.msra.mxu1 %v3517_v22 }
 0x8c5   : > { %v1642_v59 = vpop.f32.mrf.mxu0  ;;  %v1683_v20 = vpop.f32.mrf.mxu1 }
 0x8c6   : > { %v1690_v43 = vadd.f32 %v1689_v0, %v1642_v59  ;;  %v1705_v15 = vadd.f32 %v3624_v57, %v1683_v20 }
 0x8c7   : > { %v1644_v62 = vpop.f32.mrf.mxu0  ;;  %v2403_v32 = vpop.f32.mrf.mxu1 }
 0x8c8   : > { %v1696_v52 = vmul.f32 0.5, %v1690_v43  ;;  %v1695_v34 = vadd.f32 %v1694_v44, %v1644_v62  ;;  %v1871_v44 = vpop.permute.xlu1 %1870 }
 0x8c9   : > { %v1646_v55 = vpop.f32.mrf.mxu0  ;;  %v1686_v48 = vpop.f32.mrf.mxu1 }
 0x8ca   : > { %2598 = vtanh.f32 %v1696_v52  ;;  %v1700_v9 = vmul.f32 0.5, %v1695_v34 }
 0x8cb   : > { %v1647_v38 = vpop.f32.mrf.mxu0  ;;  %v2404_v3 = vpop.f32.mrf.mxu1 }
 0x8cc   : > { %2600 = vtanh.f32 %v1700_v9 }
 0x8d7   : > { %v2599_v10 = vpop.eup %2598 }
 0x8d8   : > { %v1698_v12 = vmul.f32 0.5, %v2599_v10 }
 0x8d9   : > { %v2601_v18 = vpop.eup %2600 }
 0x8da   : > { %v1699_v13 = vadd.f32 0.5, %v1698_v12  ;;  %v1702_v21 = vmul.f32 0.5, %v2601_v18 }
 0x8dc   : > { %v1706_v16 = vmul.f32 %v1705_v15, %v1699_v13  ;;  %v1703_v22 = vadd.f32 0.5, %v1702_v21 }
 0x8de   : > { %v1707_v17 = vadd.f32 %v1706_v16, %v1704_v14  ;;  %v1709_v41 = vsub.f32 1.0, %v1703_v22  ;;  %v1711_v26 = vmul.f32 %v1703_v22, %v3632_v7 }
 0x8e0   : > { %2602 = vtanh.f32 %v1707_v17 }
 0x8ed   : > { %v2603_v50 = vpop.eup %2602 }
 0x8ee   : > { %v1710_v24 = vmul.f32 %v2603_v50, %v1709_v41 }
 0x8f0   : > { %v1712_v31 = vadd.f32 %v1711_v26, %v1710_v24 }
 0x8f2   : > { %v1723_v28 = vmul.f32 %v3220_v30, %v1712_v31  ;;  %v1738_v40 = vmul.f32 %v1736_v47, %v1712_v31 }
 0x8f4   : > { %1882 = vst [vmem:[%s2979_s9 + $0x40] sm:$0xff] %v1738_v40  ;;  %v1731_v1 = vadd.f32 %v1730_v19, %v1723_v28 }
 0x8f6   : > { %v1742_v8 = vpack.c.bf16 %v1731_v1, %v1731_v1  ;;  %v1865_v48 = vmul.f32 %v3283_v29, %v1731_v1 }
 0x8f8   : > { %1776 = vmatmul.mubr.bf16.vlgmr.msra.gmra.mxu0 %v1742_v8  ;;  %2422 = vmatmul.mubr.bf16.vlgmr.msra.gmra.mxu1 %v1742_v8 }
 0x9b8   : > { %v1777_v46 = vpop.f32.mrf.mxu0  ;;  %v1818_v36 = vpop.f32.mrf.mxu1 }
 0x9b9   : > { %v1825_v60 = vadd.f32 %v1824_v39, %v1777_v46  ;;  %v1840_v7 = vadd.f32 %v3624_v57, %v1818_v36 }
 0x9ba   : > { %v1779_v61 = vpop.f32.mrf.mxu0  ;;  %v2423_v45 = vpop.f32.mrf.mxu1 }
 0x9bb   : > { %v1831_v56 = vmul.f32 0.5, %v1825_v60  ;;  %v1830_v63 = vadd.f32 %v1829_v4, %v1779_v61 }
 0x9bc   : > { %v1781_v30 = vpop.f32.mrf.mxu0  ;;  %v1821_v58 = vpop.f32.mrf.mxu1 }
 0x9bd   : > { %2604 = vtanh.f32 %v1831_v56  ;;  %v1835_v27 = vmul.f32 0.5, %v1830_v63 }
 0x9be   : > { %v1782_v2 = vpop.f32.mrf.mxu0  ;;  %v2424_v23 = vpop.f32.mrf.mxu1 }
 0x9bf   : > { %2606 = vtanh.f32 %v1835_v27 }
 0x9ca   : > { %v2605_v49 = vpop.eup %2604 }
 0x9cb   : > { %v1833_v33 = vmul.f32 0.5, %v2605_v49 }
 0x9cc   : > { %v2607_v0 = vpop.eup %2606 }
 0x9cd   : > { %v1834_v5 = vadd.f32 0.5, %v1833_v33  ;;  %v1837_v54 = vmul.f32 0.5, %v2607_v0 }
 0x9cf   : > { %v1841_v51 = vmul.f32 %v1840_v7, %v1834_v5  ;;  %v1838_v59 = vadd.f32 0.5, %v1837_v54 }
 0x9d1   : > { %v1842_v25 = vadd.f32 %v1841_v51, %v1839_v6  ;;  %v1844_v20 = vsub.f32 1.0, %v1838_v59  ;;  %v1846_v32 = vmul.f32 %v1838_v59, %v1731_v1 }
 0x9d3   : > { %2608 = vtanh.f32 %v1842_v25 }
 0x9e0   : > { %v2609_v43 = vpop.eup %2608 }
 0x9e1   : > { %v1845_v62 = vmul.f32 %v2609_v43, %v1844_v20 }
 0x9e3   : > { %v1847_v52 = vadd.f32 %v1846_v32, %v1845_v62 }
 0x9e5   : > { %v1858_v55 = vmul.f32 %v3222_v35, %v1847_v52  ;;  %v1873_v38 = vmul.f32 %v1871_v44, %v1847_v52  ;;  %1888 = sbr.rel (%p2128_p1) target bundleno = 2667 (0xa6b), region = 56 }
 0x9e7   : > { %v1866_v3 = vadd.f32 %v1865_v48, %v1858_v55  ;;  %1883 = vst [vmem:[%s2979_s9 + $0x48] sm:$0xff] %v1873_v38 }
 0x9e9   : > { %1884 = vst [vmem:[#allocation2] sm:$0xff] %v1866_v3 }
 0x9ea   : > { %v2811_v57 = vmov 0  }
 0x9eb   : > { %2635 = vset.pattern.permute.xlu0 %v2811_v57 }
 0x9ec   : > { %1891 = vperm.xlu0 %2635, %v3165_v53  }
 0xa67   : > { %v1892_v34 = vpop.permute.xlu0 %1891 }
 0xa68   : > { %v1894_v9 = vmul.f32 %v1892_v34, %v1866_v3 }
 0xa6a   : > { %1895 = vst [vmem:[#allocation9] sm:$0xff] %v1894_v9 }
 0xa6b PF: > { %s2134_s19 = smul.u32 1280, %s2794_s24  ;;  %s1913_s14 = sshll.u32 %s2979_s9, 4  ;;  %s1914_s14 = int_to_ptr.vmem [resolvable:$true] %s1913_s14 }
 0xa6c   : > { %s1897_s27 = scalar_lea.sflag [#allocation5], %s2964_s28  ;;  %s2690_s3 = scalar_lea.vmem %s1914_s14, 1280 }
 0xa6d   : > { %s1911_s11 = scalar_lea.hbm %s3741_s5, %s2134_s19  ;;  %p2691_p11 = scmp.ne.s32.totalorder %s1914_s14, %s2690_s3 }
 0xa6e   : > { %s2812_s13 = smov [#allocation8]  }
 0xa6f   : > { %p2692_p7 = pnand %p2691_p11, %p2935_p13  ;;  %s2694_s17 = sshll.u32 %s2812_s13, 4  ;;  %s2695_s17 = int_to_ptr.vmem [resolvable:$false] %s2694_s17 }
 0xa70   : > { %s2696_s29 = scalar_lea.vmem %s2695_s17, 2560  ;;  %p2697_p6 = scmp.lt.s32.totalorder %s1914_s14, %s2695_s17 }
 0xa71   : > { %p2693_p4 = pneg %p2692_p7  ;;  %p2698_p9 = scmp.lt.s32.totalorder %s2696_s29, %s2690_s3 }
 0xa73   : > { %p2699_p12 = por %p2698_p9, %p2697_p6 }
 0xa75   : > { %p2700_p0 = pnand %p2699_p12, %p2693_p4 }
 0xa77   : > { %2703 = shalt.err (!%p2700_p0)
}
 0xa78   : > { %s2704_s24 = scalar_lea.hbm %s1911_s11, 1280  ;;  %s2708_s7 = scalar_lea.hbm %s3741_s5, 2560 }
 0xa79   : > { %p2705_p3 = scmp.ne.s32.totalorder %s1911_s11, %s2704_s24  ;;  %p2709_p1 = scmp.lt.s32.totalorder %s1911_s11, %s3741_s5 }
 0xa7a   : > { %p2710_p11 = scmp.lt.s32.totalorder %s2708_s7, %s2704_s24 }
 0xa7b   : > { %p2706_p5 = pnand %p2705_p3, %p2935_p13 }
 0xa7c   : > { %p2711_p7 = por %p2710_p11, %p2709_p1 }
 0xa7d   : > { %p2707_p8 = pneg %p2706_p5 }
 0xa7f   : > { %p2712_p10 = pnand %p2711_p7, %p2707_p8 }
 0xa81   : > { %2715 = shalt.err (!%p2712_p10)
}
 0xa82   : > { %2435 = dma.vmem_to_hbm [thread:$0]  (%p2935_p13), %s1914_s14, 1280, %s1911_s11, %s1897_s27  }
 0xa83   : > { %s2813_s19 = smov [#allocation9]  }
 0xa84   : > { %s1926_s15 = sshll.u32 %s2813_s19, 4  ;;  %s1927_s15 = int_to_ptr.vmem [resolvable:$true] %s1926_s15 }
 0xa85   : > { %s2716_s16 = scalar_lea.vmem %s1927_s15, 128  ;;  %p2723_p12 = scmp.lt.s32.totalorder %s1927_s15, %s1927_s15 }
 0xa86   : > { %p2717_p4 = scmp.ne.s32.totalorder %s1927_s15, %s2716_s16  ;;  %p2724_p0 = scmp.lt.s32.totalorder %s2716_s16, %s2716_s16 }
 0xa88   : > { %p2718_p6 = pnand %p2717_p4, %p2887_p2  ;;  %p2725_p3 = por %p2724_p0, %p2723_p12 }
 0xa8a   : > { %p2719_p9 = pneg %p2718_p6 }
 0xa8c   : > { %p2726_p5 = pnand %p2725_p3, %p2719_p9 }
 0xa8e   : > { %2729 = shalt.err (!%p2726_p5)
}
 0xa8f   : > { %2437 = dma.vmem_to_hbm [thread:$0]  (%p2887_p2), %s1927_s15, 128, %s3742_s6, [#allocation10]  }
 0xa90   : > { %2773 = dma.done.wait (%p2887_p2), [#allocation10], 128  }
 0xa91   : > { %2775 = vsyncadd (%p2887_p2), [#allocation10], 4294967168 }
 0xa92 PF: > { %s1942_s20 = sand.u32 1, %s2782_s21   ;;  %p3764_p10 = scmp.ne.s32.totalorder %s3753_s8, 0 }
 0xa93   : > { %p3765_p13 = scmp.ge.s32.totalorder %s2802_s26, 2  ;;  %s1943_s14 = scalar_lea.sflag [#allocation5], %s1942_s20 }
 0xa95   : > { %p2450_p8 = pnand %p3765_p13, %p3764_p10 }
 0xa97   : > { %p2451_p1 = pneg %p2450_p8 }
 0xa99   : > { %2777 = dma.done.wait (%p2451_p1), %s1943_s14, 1280  }
 0xa9a   : > { %2779 = vsyncadd (%p2451_p1), %s1943_s14, 4294966016  ;;  %s25_s26 = sadd.s32 1, %s2802_s26   ;;  %s3766_s30 = sld [smem:[#allocation15_spill]] }
 0xa9b   : > { %p22_p11 = scmp.ge.s32.totalorder %s25_s26, 4   ;;  %s3767_s21 = smov %s2786_s22 }
 0xa9c   : > { %s3768_s22 = smov %s2790_s23  ;;  %s3769_s23 = smov %s2944_s12 }
 0xa9d   : > { %s3770_s24 = smov %s2798_s25  ;;  %24 = sbr.rel (!%p22_p11) target bundleno = 10 (0xa), region = 121 }
 0xaa0   : > { %s3771_s25 = smov %s3766_s30 }
 0xaa2   :  { %1948 = vsyncpa [#allocation4], 1 }
 0xaa3   :  { %1950 = vsyncpa [#allocation4 + $0x1], 1 }
 0xaa4   :  { %1951 = vsyncpa [#allocation7], 1 }
 0xaa5   :  { %1952 = vsyncpa [#allocation5], 1 }
 0xaa6   :  { %1954 = vsyncpa [#allocation5 + $0x1], 1 }
 0xaa7   :  { %1955 = vsyncpa [#allocation10], 1 }

</bundles_post_ra>
